<compile_context>
chip_gen: v7x
topology: tpu7x:2x2x1
jax: 0.10.0
libtpu: 0.0.40
codegen_flags: <defaults>
</compile_context>

<pallas_src>
import jax
import jax.numpy as jnp
from jax import lax
from jax.experimental import pallas as pl
from jax.experimental.pallas import tpu as pltpu

BN_EPS = 1e-5


# --------------------------------------------------------------------------
# Pass 1: conv1 (3x3, stride s) [+ 1x1 projection shortcut] + BN partial sums
# --------------------------------------------------------------------------
def _make_conv1_kernel(stride, H, W, Cin, Cout, has_proj):
    Ho = (H - 1) // stride + 1
    Wo = (W - 1) // stride + 1
    P = Ho * Wo                       # samples per batch tile (bt == 1)
    hi = (Ho - 1) * stride + 1        # input-coordinate extent of the window
    wi = (Wo - 1) * stride + 1

    def kernel(*refs):
        if has_proj:
            x_ref, w1_ref, ws_ref, y1_ref, s1_ref, sc_ref, ss_ref = refs
        else:
            x_ref, w1_ref, y1_ref, s1_ref = refs

        x = x_ref[...]                                   # (1, H+2, W+2, Cin) bf16

        # im2col: fuse the 9 taps into the contraction dim -> one K=9*Cin dot.
        cols = []
        for dh in range(3):
            for dw in range(3):
                tap = x[:, dh:dh + hi:stride, dw:dw + wi:stride, :]
                cols.append(tap.reshape(P, Cin))
        patches = jnp.concatenate(cols, axis=-1)         # (P, 9*Cin) bf16
        y1 = jnp.dot(patches, w1_ref[...],
                     preferred_element_type=jnp.float32)  # (P, Cout) f32, 1-pass MXU
        y1_ref[...] = y1.reshape(1, Ho, Wo, Cout)
        # Per-tile BN partial statistics (sum, sum of squares).
        s1_ref[:, 0:1, :] = jnp.sum(y1, axis=0, keepdims=True).reshape(1, 1, Cout)
        s1_ref[:, 1:2, :] = jnp.sum(y1 * y1, axis=0, keepdims=True).reshape(1, 1, Cout)

        if has_proj:
            xs = x[:, 1:1 + hi:stride, 1:1 + wi:stride, :].reshape(P, Cin)
            sc = jnp.dot(xs, ws_ref[...],
                         preferred_element_type=jnp.float32)   # 1x1 conv shortcut
            sc_ref[...] = sc.reshape(1, Ho, Wo, Cout)
            ss_ref[:, 0:1, :] = jnp.sum(sc, axis=0, keepdims=True).reshape(1, 1, Cout)
            ss_ref[:, 1:2, :] = jnp.sum(sc * sc, axis=0, keepdims=True).reshape(1, 1, Cout)

    return kernel


# --------------------------------------------------------------------------
# Pass 2: folded bn1 + ReLU -> conv2 (3x3, stride 1) + BN partial sums
# --------------------------------------------------------------------------
def _make_conv2_kernel(Ho, Wo, Cout):
    P = Ho * Wo

    def kernel(y1_ref, a1_ref, b1_ref, w2_ref, y2_ref, s2_ref, hpad_ref):
        # bn1 folded to scale/shift (f32) + fused ReLU, then bf16 for the MXU.
        h1 = jnp.maximum(y1_ref[...] * a1_ref[...] + b1_ref[...], 0.0)
        h1b = h1.astype(jnp.bfloat16)                    # (1, Ho, Wo, Cout)

        # Halo scratch (bf16): zero ONLY the 1-pixel border, store the interior once.
        hpad_ref[:, 0:1, :, :] = jnp.zeros((1, 1, Wo + 2, Cout), jnp.bfloat16)
        hpad_ref[:, Ho + 1:Ho + 2, :, :] = jnp.zeros((1, 1, Wo + 2, Cout), jnp.bfloat16)
        hpad_ref[:, 1:Ho + 1, 0:1, :] = jnp.zeros((1, Ho, 1, Cout), jnp.bfloat16)
        hpad_ref[:, 1:Ho + 1, Wo + 1:Wo + 2, :] = jnp.zeros((1, Ho, 1, Cout), jnp.bfloat16)
        hpad_ref[:, 1:Ho + 1, 1:Wo + 1, :] = h1b
        hp = hpad_ref[...]                               # (1, Ho+2, Wo+2, Cout) bf16

        cols = []
        for dh in range(3):
            for dw in range(3):
                cols.append(hp[:, dh:dh + Ho, dw:dw + Wo, :].reshape(P, Cout))
        patches = jnp.concatenate(cols, axis=-1)         # (P, 9*Cout) bf16
        y2 = jnp.dot(patches, w2_ref[...],
                     preferred_element_type=jnp.float32)  # (P, Cout) f32
        y2_ref[...] = y2.reshape(1, Ho, Wo, Cout)
        s2_ref[:, 0:1, :] = jnp.sum(y2, axis=0, keepdims=True).reshape(1, 1, Cout)
        s2_ref[:, 1:2, :] = jnp.sum(y2 * y2, axis=0, keepdims=True).reshape(1, 1, Cout)

    return kernel


# --------------------------------------------------------------------------
# Pass 3: folded bn2 + (folded bn_s) shortcut + residual add + ReLU
# --------------------------------------------------------------------------
def _finalize_kernel(y2_ref, sc_ref, a2_ref, b2_ref, as_ref, bs_ref, o_ref):
    out = (y2_ref[...] * a2_ref[...] + b2_ref[...]
           + sc_ref[...] * as_ref[...] + bs_ref[...])
    o_ref[...] = jnp.maximum(out, 0.0)


# --------------------------------------------------------------------------
# Wrapper
# --------------------------------------------------------------------------
def _fold_bn(stats, gamma, beta, n):
    """Reduce per-tile (sum, sumsq) -> per-channel BN scale/shift, (1,1,1,C)."""
    s = jnp.sum(stats[:, 0, :], axis=0)
    ss = jnp.sum(stats[:, 1, :], axis=0)
    mean = s / n
    var = ss / n - mean * mean          # biased variance (PyTorch BN forward)
    scale = gamma * lax.rsqrt(var + BN_EPS)
    shift = beta - mean * scale
    C = scale.shape[0]
    return (scale.reshape(1, 1, 1, C).astype(jnp.float32),
            shift.reshape(1, 1, 1, C).astype(jnp.float32))


def basic_block_pallas(x_nchw, params, stride):
    B, Cin, H, W = x_nchw.shape
    Cout = params["w1"].shape[0]
    has_proj = "ws" in params
    Ho = (H - 1) // stride + 1
    Wo = (W - 1) // stride + 1
    n_bn = B * Ho * Wo                     # BN sample count per channel
    f32, bf16 = jnp.float32, jnp.bfloat16

    # NCHW -> NHWC, pad for the first 3x3 conv, bf16 activations for the MXU.
    x_nhwc = jnp.transpose(x_nchw, (0, 2, 3, 1)).astype(f32)
    x_pad = jnp.pad(x_nhwc, ((0, 0), (1, 1), (1, 1), (0, 0))).astype(bf16)

    # OIHW -> HWIO -> im2col weight matrices (K = 9*C), bf16.
    w1 = jnp.transpose(params["w1"], (2, 3, 1, 0)).reshape(9 * Cin, Cout).astype(bf16)
    w2 = jnp.transpose(params["w2"], (2, 3, 1, 0)).reshape(9 * Cout, Cout).astype(bf16)

    cparams = pltpu.CompilerParams(dimension_semantics=("parallel",))
    grid = (B,)  # one image per grid step (bt = 1); pipelined + megacore-parallel

    def tile4(Hd, Wd, C):
        return pl.BlockSpec((1, Hd, Wd, C), lambda b: (b, 0, 0, 0))

    def full2(r, c):
        return pl.BlockSpec((r, c), lambda b: (0, 0))

    vec_spec = pl.BlockSpec((1, 1, 1, Cout), lambda b: (0, 0, 0, 0))
    stats_spec = pl.BlockSpec((1, 2, Cout), lambda b: (b, 0, 0))

    # -------- pass 1: conv1 (+ projection) + partial BN stats -------------
    k1 = _make_conv1_kernel(stride, H, W, Cin, Cout, has_proj)
    in_specs = [tile4(H + 2, W + 2, Cin), full2(9 * Cin, Cout)]
    args = [x_pad, w1]
    out_shape = [jax.ShapeDtypeStruct((B, Ho, Wo, Cout), f32),
                 jax.ShapeDtypeStruct((B, 2, Cout), f32)]
    out_specs = [tile4(Ho, Wo, Cout), stats_spec]
    if has_proj:
        ws = params["ws"][:, :, 0, 0].T.astype(bf16)      # (Cin, Cout)
        in_specs.append(full2(Cin, Cout))
        args.append(ws)
        out_shape += [jax.ShapeDtypeStruct((B, Ho, Wo, Cout), f32),
                      jax.ShapeDtypeStruct((B, 2, Cout), f32)]
        out_specs += [tile4(Ho, Wo, Cout), stats_spec]

    res = pl.pallas_call(
        k1, grid=grid, in_specs=in_specs, out_specs=out_specs,
        out_shape=out_shape, compiler_params=cparams)(*args)
    if has_proj:
        y1_raw, st1, sc_raw, st_s = res
    else:
        y1_raw, st1 = res
        sc_raw = x_nhwc        # identity shortcut (stride==1, Cin==Cout), f32

    scale1, shift1 = _fold_bn(st1, params["g1"], params["b1"], n_bn)

    # -------- pass 2: bn1 + ReLU + conv2 + partial BN stats ----------------
    k2 = _make_conv2_kernel(Ho, Wo, Cout)
    y2_raw, st2 = pl.pallas_call(
        k2, grid=grid,
        in_specs=[tile4(Ho, Wo, Cout), vec_spec, vec_spec, full2(9 * Cout, Cout)],
        out_specs=[tile4(Ho, Wo, Cout), stats_spec],
        out_shape=[jax.ShapeDtypeStruct((B, Ho, Wo, Cout), f32),
                   jax.ShapeDtypeStruct((B, 2, Cout), f32)],
        scratch_shapes=[pltpu.VMEM((1, Ho + 2, Wo + 2, Cout), bf16)],
        compiler_params=cparams)(y1_raw, scale1, shift1, w2)

    scale2, shift2 = _fold_bn(st2, params["g2"], params["b2"], n_bn)
    if has_proj:
        scale_s, shift_s = _fold_bn(st_s, params["gs"], params["bs"], n_bn)
    else:
        scale_s = jnp.ones((1, 1, 1, Cout), f32)
        shift_s = jnp.zeros((1, 1, 1, Cout), f32)

    # -------- pass 3: bn2 + shortcut + residual add + ReLU -----------------
    out = pl.pallas_call(
        _finalize_kernel, grid=grid,
        in_specs=[tile4(Ho, Wo, Cout), tile4(Ho, Wo, Cout),
                  vec_spec, vec_spec, vec_spec, vec_spec],
        out_specs=tile4(Ho, Wo, Cout),
        out_shape=jax.ShapeDtypeStruct((B, Ho, Wo, Cout), f32),
        compiler_params=cparams)(y2_raw, sc_raw, scale2, shift2, scale_s, shift_s)

    return jnp.transpose(out, (0, 3, 1, 2))               # NHWC -> NCHW


# --------------------------------------------------------------------------
# Parameters / reference
# --------------------------------------------------------------------------
def init_params(key, in_channels, out_channels, stride):
    ks = jax.random.split(key, 3)
    w1 = jax.random.normal(ks[0], (out_channels, in_channels, 3, 3),
                           jnp.float32) * (2.0 / (in_channels * 9)) ** 0.5
    w2 = jax.random.normal(ks[1], (out_channels, out_channels, 3, 3),
                           jnp.float32) * (2.0 / (out_channels * 9)) ** 0.5
    params = dict(
        w1=w1, g1=jnp.ones((out_channels,), jnp.float32),
        b1=jnp.zeros((out_channels,), jnp.float32),
        w2=w2, g2=jnp.ones((out_channels,), jnp.float32),
        b2=jnp.zeros((out_channels,), jnp.float32),
    )
    if stride != 1 or in_channels != out_channels:
        ws = jax.random.normal(ks[2], (out_channels, in_channels, 1, 1),
                               jnp.float32) * (2.0 / in_channels) ** 0.5
        params.update(ws=ws, gs=jnp.ones((out_channels,), jnp.float32),
                      bs=jnp.zeros((out_channels,), jnp.float32))
    return params


def _ref_forward(x, params, stride):
    """Pure-JAX NCHW reference (PyTorch BasicBlock, training-mode BN) using the
    same bf16-input / f32-accumulate matmul numerics as the kernel."""
    bf16 = jnp.bfloat16

    def conv(y, w, s, p):
        return lax.conv_general_dilated(
            y.astype(bf16), w.astype(bf16), (s, s), ((p, p), (p, p)),
            dimension_numbers=("NCHW", "OIHW", "NCHW"),
            preferred_element_type=jnp.float32)

    def bn(y, g, b):
        mean = y.mean(axis=(0, 2, 3), keepdims=True)
        var = y.var(axis=(0, 2, 3), keepdims=True)      # biased, like PyTorch BN fwd
        return ((y - mean) * lax.rsqrt(var + BN_EPS)
                * g.reshape(1, -1, 1, 1) + b.reshape(1, -1, 1, 1))

    h = jax.nn.relu(bn(conv(x, params["w1"], stride, 1), params["g1"], params["b1"]))
    h = bn(conv(h, params["w2"], 1, 1), params["g2"], params["b2"])
    if "ws" in params:
        sc = bn(conv(x, params["ws"], stride, 0), params["gs"], params["bs"])
    else:
        sc = x
    return jax.nn.relu(h + sc)


if __name__ == "__main__":
    key = jax.random.PRNGKey(0)
    kx, kp = jax.random.split(key)

    configs = [
        dict(B=2, Cin=4, Cout=8, H=16, W=16, stride=1),   # projection shortcut
        dict(B=2, Cin=8, Cout=8, H=16, W=16, stride=1),   # identity shortcut
    ]
    for cfg in configs:
        B, Cin, Cout, H, W, stride = (cfg["B"], cfg["Cin"], cfg["Cout"],
                                      cfg["H"], cfg["W"], cfg["stride"])
        x = jax.random.normal(kx, (B, Cin, H, W), jnp.float32)
        params = init_params(kp, Cin, Cout, stride)

        out = jax.block_until_ready(basic_block_pallas(x, params, stride))
        ref = _ref_forward(x, params, stride)
        assert out.shape == ref.shape == (B, Cout, H // stride, W // stride)
        max_err = float(jnp.max(jnp.abs(out - ref)))
        # Same bf16 roundings on both sides; differences are accumulation-order
        # level plus rare 1-ulp bf16 boundary flips -> 1e-2 is a safe bound.
        assert max_err < 1e-2, f"max abs err {max_err} (cfg={cfg})"

    print("KERNEL_OK")
</pallas_src>

<mosaic_0001>
module attributes {stable_mosaic.version = 11 : i64} {
  func.func @kernel(%arg0: i32, %arg1: memref<1x18x18x4xbf16, #tpu.memory_space<vmem>>, %arg2: memref<36x8xbf16, #tpu.memory_space<vmem>>, %arg3: memref<4x8xbf16, #tpu.memory_space<vmem>>, %arg4: memref<1x16x16x8xf32, #tpu.memory_space<vmem>>, %arg5: memref<1x2x8xf32, #tpu.memory_space<vmem>>, %arg6: memref<1x16x16x8xf32, #tpu.memory_space<vmem>>, %arg7: memref<1x2x8xf32, #tpu.memory_space<vmem>>) attributes {dimension_semantics = [#tpu.dimension_semantics<parallel>], iteration_bounds = array<i64: 2>, scalar_prefetch = 0 : i64, scratch_operands = 0 : i64, tpu.core_type = #tpu.core_type<tc>, window_params = [{transform_indices = @transform_0, window_bounds = array<i64: 1, 18, 18, 4>}, {pipeline_mode = #tpu.pipeline_mode<synchronous>, transform_indices = @transform_1, window_bounds = array<i64: 36, 8>}, {pipeline_mode = #tpu.pipeline_mode<synchronous>, transform_indices = @transform_2, window_bounds = array<i64: 4, 8>}, {transform_indices = @transform_3, window_bounds = array<i64: 1, 16, 16, 8>}, {transform_indices = @transform_4, window_bounds = array<i64: 1, 2, 8>}, {transform_indices = @transform_5, window_bounds = array<i64: 1, 16, 16, 8>}, {transform_indices = @transform_6, window_bounds = array<i64: 1, 2, 8>}]} {
    %c0 = arith.constant 0 : index
    %c0_0 = arith.constant 0 : index
    %c0_1 = arith.constant 0 : index
    %c0_2 = arith.constant 0 : index
    %0 = vector.load %arg1[%c0, %c0_0, %c0_1, %c0_2] : memref<1x18x18x4xbf16, #tpu.memory_space<vmem>>, vector<1x18x18x4xbf16>
    %1 = vector.extract_strided_slice %0 {offsets = [0, 0, 0, 0], sizes = [1, 16, 16, 4], strides = [1, 1, 1, 1]} : vector<1x18x18x4xbf16> to vector<1x16x16x4xbf16>
    %2 = vector.shape_cast %1 : vector<1x16x16x4xbf16> to vector<256x4xbf16>
    %3 = vector.extract_strided_slice %0 {offsets = [0, 0, 1, 0], sizes = [1, 16, 16, 4], strides = [1, 1, 1, 1]} : vector<1x18x18x4xbf16> to vector<1x16x16x4xbf16>
    %4 = vector.shape_cast %3 : vector<1x16x16x4xbf16> to vector<256x4xbf16>
    %5 = vector.extract_strided_slice %0 {offsets = [0, 0, 2, 0], sizes = [1, 16, 16, 4], strides = [1, 1, 1, 1]} : vector<1x18x18x4xbf16> to vector<1x16x16x4xbf16>
    %6 = vector.shape_cast %5 : vector<1x16x16x4xbf16> to vector<256x4xbf16>
    %7 = vector.extract_strided_slice %0 {offsets = [0, 1, 0, 0], sizes = [1, 16, 16, 4], strides = [1, 1, 1, 1]} : vector<1x18x18x4xbf16> to vector<1x16x16x4xbf16>
    %8 = vector.shape_cast %7 : vector<1x16x16x4xbf16> to vector<256x4xbf16>
    %9 = vector.extract_strided_slice %0 {offsets = [0, 1, 1, 0], sizes = [1, 16, 16, 4], strides = [1, 1, 1, 1]} : vector<1x18x18x4xbf16> to vector<1x16x16x4xbf16>
    %10 = vector.shape_cast %9 : vector<1x16x16x4xbf16> to vector<256x4xbf16>
    %11 = vector.extract_strided_slice %0 {offsets = [0, 1, 2, 0], sizes = [1, 16, 16, 4], strides = [1, 1, 1, 1]} : vector<1x18x18x4xbf16> to vector<1x16x16x4xbf16>
    %12 = vector.shape_cast %11 : vector<1x16x16x4xbf16> to vector<256x4xbf16>
    %13 = vector.extract_strided_slice %0 {offsets = [0, 2, 0, 0], sizes = [1, 16, 16, 4], strides = [1, 1, 1, 1]} : vector<1x18x18x4xbf16> to vector<1x16x16x4xbf16>
    %14 = vector.shape_cast %13 : vector<1x16x16x4xbf16> to vector<256x4xbf16>
    %15 = vector.extract_strided_slice %0 {offsets = [0, 2, 1, 0], sizes = [1, 16, 16, 4], strides = [1, 1, 1, 1]} : vector<1x18x18x4xbf16> to vector<1x16x16x4xbf16>
    %16 = vector.shape_cast %15 : vector<1x16x16x4xbf16> to vector<256x4xbf16>
    %17 = vector.extract_strided_slice %0 {offsets = [0, 2, 2, 0], sizes = [1, 16, 16, 4], strides = [1, 1, 1, 1]} : vector<1x18x18x4xbf16> to vector<1x16x16x4xbf16>
    %18 = vector.shape_cast %17 : vector<1x16x16x4xbf16> to vector<256x4xbf16>
    %19 = tpu.concatenate %2, %4, %6, %8, %10, %12, %14, %16, %18 in 1 : vector<256x4xbf16>, vector<256x4xbf16>, vector<256x4xbf16>, vector<256x4xbf16>, vector<256x4xbf16>, vector<256x4xbf16>, vector<256x4xbf16>, vector<256x4xbf16>, vector<256x4xbf16> -> vector<256x36xbf16>
    %c0_3 = arith.constant 0 : index
    %c0_4 = arith.constant 0 : index
    %20 = vector.load %arg2[%c0_3, %c0_4] : memref<36x8xbf16, #tpu.memory_space<vmem>>, vector<36x8xbf16>
    %cst = arith.constant dense<0.000000e+00> : vector<256x8xf32>
    %21 = tpu.matmul %19, %20, %cst {dimension_numbers = #tpu.dot_dimension_numbers<[1], [0], [0], [1], [0, 0, 1, 1], [], []>} : vector<256x36xbf16>, vector<36x8xbf16>, vector<256x8xf32> -> vector<256x8xf32>
    %22 = vector.shape_cast %21 : vector<256x8xf32> to vector<1x16x16x8xf32>
    %c0_5 = arith.constant 0 : index
    %c0_6 = arith.constant 0 : index
    %c0_7 = arith.constant 0 : index
    %c0_8 = arith.constant 0 : index
    %23 = vector.load %arg4[%c0_5, %c0_6, %c0_7, %c0_8] : memref<1x16x16x8xf32, #tpu.memory_space<vmem>>, vector<1x16x16x8xf32>
    tpu.vector_store %arg4[%c0_5, %c0_6, %c0_7, %c0_8], %22 {strides = array<i32>} : memref<1x16x16x8xf32, #tpu.memory_space<vmem>>, vector<1x16x16x8xf32>,
    %cst_9 = arith.constant dense<0.000000e+00> : vector<8xf32>
    %24 = vector.multi_reduction <add>, %21, %cst_9 [0] : vector<256x8xf32> to vector<8xf32>
    %25 = vector.shape_cast %24 : vector<8xf32> to vector<1x8xf32>
    %26 = vector.shape_cast %25 : vector<1x8xf32> to vector<1x1x8xf32>
    %c0_10 = arith.constant 0 : index
    %c0_11 = arith.constant 0 : index
    %c0_12 = arith.constant 0 : index
    %27 = vector.load %arg5[%c0_10, %c0_11, %c0_12] : memref<1x2x8xf32, #tpu.memory_space<vmem>>, vector<1x1x8xf32>
    tpu.vector_store %arg5[%c0_10, %c0_11, %c0_12], %26 {strides = array<i32>} : memref<1x2x8xf32, #tpu.memory_space<vmem>>, vector<1x1x8xf32>,
    %28 = arith.mulf %21, %21 : vector<256x8xf32>
    %cst_13 = arith.constant dense<0.000000e+00> : vector<8xf32>
    %29 = vector.multi_reduction <add>, %28, %cst_13 [0] : vector<256x8xf32> to vector<8xf32>
    %30 = vector.shape_cast %29 : vector<8xf32> to vector<1x8xf32>
    %31 = vector.shape_cast %30 : vector<1x8xf32> to vector<1x1x8xf32>
    %c0_14 = arith.constant 0 : index
    %c1 = arith.constant 1 : index
    %c0_15 = arith.constant 0 : index
    %32 = vector.load %arg5[%c0_14, %c1, %c0_15] : memref<1x2x8xf32, #tpu.memory_space<vmem>>, vector<1x1x8xf32>
    tpu.vector_store %arg5[%c0_14, %c1, %c0_15], %31 {strides = array<i32>} : memref<1x2x8xf32, #tpu.memory_space<vmem>>, vector<1x1x8xf32>,
    %33 = vector.extract_strided_slice %0 {offsets = [0, 1, 1, 0], sizes = [1, 16, 16, 4], strides = [1, 1, 1, 1]} : vector<1x18x18x4xbf16> to vector<1x16x16x4xbf16>
    %34 = vector.shape_cast %33 : vector<1x16x16x4xbf16> to vector<256x4xbf16>
    %c0_16 = arith.constant 0 : index
    %c0_17 = arith.constant 0 : index
    %35 = vector.load %arg3[%c0_16, %c0_17] : memref<4x8xbf16, #tpu.memory_space<vmem>>, vector<4x8xbf16>
    %cst_18 = arith.constant dense<0.000000e+00> : vector<256x8xf32>
    %36 = tpu.matmul %34, %35, %cst_18 {dimension_numbers = #tpu.dot_dimension_numbers<[1], [0], [0], [1], [0, 0, 1, 1], [], []>} : vector<256x4xbf16>, vector<4x8xbf16>, vector<256x8xf32> -> vector<256x8xf32>
    %37 = vector.shape_cast %36 : vector<256x8xf32> to vector<1x16x16x8xf32>
    %c0_19 = arith.constant 0 : index
    %c0_20 = arith.constant 0 : index
    %c0_21 = arith.constant 0 : index
    %c0_22 = arith.constant 0 : index
    %38 = vector.load %arg6[%c0_19, %c0_20, %c0_21, %c0_22] : memref<1x16x16x8xf32, #tpu.memory_space<vmem>>, vector<1x16x16x8xf32>
    tpu.vector_store %arg6[%c0_19, %c0_20, %c0_21, %c0_22], %37 {strides = array<i32>} : memref<1x16x16x8xf32, #tpu.memory_space<vmem>>, vector<1x16x16x8xf32>,
    %cst_23 = arith.constant dense<0.000000e+00> : vector<8xf32>
    %39 = vector.multi_reduction <add>, %36, %cst_23 [0] : vector<256x8xf32> to vector<8xf32>
    %40 = vector.shape_cast %39 : vector<8xf32> to vector<1x8xf32>
    %41 = vector.shape_cast %40 : vector<1x8xf32> to vector<1x1x8xf32>
    %c0_24 = arith.constant 0 : index
    %c0_25 = arith.constant 0 : index
    %c0_26 = arith.constant 0 : index
    %42 = vector.load %arg7[%c0_24, %c0_25, %c0_26] : memref<1x2x8xf32, #tpu.memory_space<vmem>>, vector<1x1x8xf32>
    tpu.vector_store %arg7[%c0_24, %c0_25, %c0_26], %41 {strides = array<i32>} : memref<1x2x8xf32, #tpu.memory_space<vmem>>, vector<1x1x8xf32>,
    %43 = arith.mulf %36, %36 : vector<256x8xf32>
    %cst_27 = arith.constant dense<0.000000e+00> : vector<8xf32>
    %44 = vector.multi_reduction <add>, %43, %cst_27 [0] : vector<256x8xf32> to vector<8xf32>
    %45 = vector.shape_cast %44 : vector<8xf32> to vector<1x8xf32>
    %46 = vector.shape_cast %45 : vector<1x8xf32> to vector<1x1x8xf32>
    %c0_28 = arith.constant 0 : index
    %c1_29 = arith.constant 1 : index
    %c0_30 = arith.constant 0 : index
    %47 = vector.load %arg7[%c0_28, %c1_29, %c0_30] : memref<1x2x8xf32, #tpu.memory_space<vmem>>, vector<1x1x8xf32>
    tpu.vector_store %arg7[%c0_28, %c1_29, %c0_30], %46 {strides = array<i32>} : memref<1x2x8xf32, #tpu.memory_space<vmem>>, vector<1x1x8xf32>,
    return
  }
  func.func @transform_0(%arg0: i32) -> (i32, i32, i32, i32) {
    %c0_i32 = arith.constant 0 : i32
    %c0_i32_0 = arith.constant 0 : i32
    %c0_i32_1 = arith.constant 0 : i32
    %c0_i32_2 = arith.constant 0 : i32
    return %arg0, %c0_i32, %c0_i32_0, %c0_i32_1 : i32, i32, i32, i32
  }
  func.func @transform_1(%arg0: i32) -> (i32, i32) {
    %c0_i32 = arith.constant 0 : i32
    %c0_i32_0 = arith.constant 0 : i32
    %c0_i32_1 = arith.constant 0 : i32
    return %c0_i32, %c0_i32_0 : i32, i32
  }
  func.func @transform_2(%arg0: i32) -> (i32, i32) {
    %c0_i32 = arith.constant 0 : i32
    %c0_i32_0 = arith.constant 0 : i32
    %c0_i32_1 = arith.constant 0 : i32
    return %c0_i32, %c0_i32_0 : i32, i32
  }
  func.func @transform_3(%arg0: i32) -> (i32, i32, i32, i32) {
    %c0_i32 = arith.constant 0 : i32
    %c0_i32_0 = arith.constant 0 : i32
    %c0_i32_1 = arith.constant 0 : i32
    %c0_i32_2 = arith.constant 0 : i32
    return %arg0, %c0_i32, %c0_i32_0, %c0_i32_1 : i32, i32, i32, i32
  }
  func.func @transform_4(%arg0: i32) -> (i32, i32, i32) {
    %c0_i32 = arith.constant 0 : i32
    %c0_i32_0 = arith.constant 0 : i32
    %c0_i32_1 = arith.constant 0 : i32
    return %arg0, %c0_i32, %c0_i32_0 : i32, i32, i32
  }
  func.func @transform_5(%arg0: i32) -> (i32, i32, i32, i32) {
    %c0_i32 = arith.constant 0 : i32
    %c0_i32_0 = arith.constant 0 : i32
    %c0_i32_1 = arith.constant 0 : i32
    %c0_i32_2 = arith.constant 0 : i32
    return %arg0, %c0_i32, %c0_i32_0, %c0_i32_1 : i32, i32, i32, i32
  }
  func.func @transform_6(%arg0: i32) -> (i32, i32, i32) {
    %c0_i32 = arith.constant 0 : i32
    %c0_i32_0 = arith.constant 0 : i32
    %c0_i32_1 = arith.constant 0 : i32
    return %arg0, %c0_i32, %c0_i32_0 : i32, i32, i32
  }
}

</mosaic_0001>

<bundles_post_ra>
// kernel: tpu_custom_call.1
= control target key start
LH: loop header
LB: loop body
LE: loop exit
PB: predicated region body
PF: predicated region fallthrough
CT: control target
= control target key end

     0   :  { %12 = vsyncpa [#allocation3], 0  ;;  %s4576_s0 = inlined_call_operand.vmem [shape: bf16[2,18,18,4], index: 0, kind: input, shape index: {}]   ;;  %s4577_s1 = inlined_call_operand.vmem [shape: bf16[36,8], index: 1, kind: input, shape index: {}]   ;;  %s4578_s2 = inlined_call_operand.vmem [shape: bf16[4,8], index: 2, kind: input, shape index: {}]   ;;  %s4579_s3 = inlined_call_operand.vmem [shape: f32[2,16,16,8], index: 3, kind: output, shape index: {0}]   ;;  %s4580_s4 = inlined_call_operand.hbm [shape: f32[2,2,8], index: 4, kind: output, shape index: {1}]   ;;  %s4581_s5 = inlined_call_operand.vmem [shape: f32[2,16,16,8], index: 5, kind: output, shape index: {2}]   ;;  %s4582_s6 = inlined_call_operand.hbm [shape: f32[2,2,8], index: 6, kind: output, shape index: {3}]  }
   0x1   :  { %14 = vsyncpa [#allocation3 + $0x1], 0 }
   0x2   :  { %15 = vsyncpa [#allocation5], 0 }
   0x3   :  { %17 = vsyncpa [#allocation5 + $0x1], 0  ;;  %s3136_s21 = smov 0   ;;  %s3138_s22 = smov 0  }
   0x4   :  { %s3140_s23 = smov 0   ;;  %s3142_s24 = smov 0  }
   0x5 LB: > { %s3157_s25 = sadd.s32 4294967295, %s3089_s24   ;;  %s2685_s26 = sadd.s32 4294967294, %s3089_s24   ;;  %s3089_s24 = sphi %s3142_s24, %s4592_s24   ;;  %s3085_s23 = sphi %s3140_s23, %s4591_s23   ;;  %s3081_s22 = sphi %s3138_s22, %s4590_s22   ;;  %s3077_s21 = sphi %s3136_s21, %s4589_s21  }
   0x6   : > { %s3161_s27 = sadd.s32 1, %s3089_s24   ;;  %s124_s28 = sadd.s32 1, %s3085_s23 }
   0x7   : > { %s121_s29 = ssub.s32 %s3089_s24, %s3161_s27  ;;  %p134_p0 = scmp.ne.s32.totalorder %s3085_s23, %s3081_s22 }
   0x8   : > { %p122_p1 = scmp.eq.s32.totalorder %s121_s29, 0  ;;  %p135_p2 = scmp.eq.s32.totalorder %s3157_s25, 1 }
   0x9   : > { %p140_p3 = scmp.ne.s32.totalorder %s3081_s22, %s3077_s21  ;;  %p141_p4 = scmp.eq.s32.totalorder %s2685_s26, 1 }
   0xa   : > { %s3172_s30 = scalar_select %p122_p1, %s3085_s23, %s124_s28  }
   0xb   : > { %p3174_p5 = por %p135_p2, %p134_p0  ;;  %p3178_p6 = por %p141_p4, %p140_p3 }
   0xc   : > { %p2688_p7 = scmp.ge.s32.totalorder %s3089_s24, 1  ;;  %p225_p8 = scmp.lt.s32.totalorder %s3089_s24, 3 }
   0xe   : > { %p226_p9 = pnand %p2688_p7, %p225_p8 }
   0xf   : > { %p270_p10 = scmp.lt.s32.totalorder (!%p226_p9), %s3157_s25, 1  ;;  %vm775_vm0 = vcmask (!%p226_p9), 1042432   ;;  %vm776_vm1 = vcmask (!%p226_p9), 1046532   ;;  %vm340_vm2 = vsmask.f32 (!%p226_p9), 3328  ;;  %s3091_s14 = smov (!%p226_p9), 12  }
  0x10   : > { %229 = sbr.rel (%p226_p9) target bundleno = 658 (0x292), region = 32  ;;  %vm341_vm3 = vsmask.f32 (!%p226_p9), 7440  ;;  %vm3237_vm4 = vmor (!%p226_p9), %vm775_vm0, %vm776_vm1  ;;  %s3092_s15 = smov (!%p226_p9), 20   ;;  %vm1376_vm6 = vcmask (!%p226_p9), 31744   ;;  %vm1709_vm7 = vcmask (!%p226_p9), 1041408  }
  0x11   : > { %vm3266_vm5 = vmor (!%p226_p9), %vm340_vm2, %vm341_vm3  ;;  %s3093_s16 = smov (!%p226_p9), 8   ;;  %s3094_s19 = smov (!%p226_p9), 4   ;;  %vm1425_vm8 = vcmask (!%p226_p9), 64512   ;;  %vm1458_vm9 = vcmask (!%p226_p9), 97280   ;;  %vm1491_vm10 = vcmask (!%p226_p9), 130048   ;;  %vm1524_vm11 = vcmask (!%p226_p9), 162816  }
  0x12   : > { %s3095_s28 = smov (!%p226_p9), 16   ;;  %s3096_s29 = smov (!%p226_p9), 24   ;;  %vm1557_vm12 = vcmask (!%p226_p9), 195584   ;;  %vm1590_vm13 = vcmask (!%p226_p9), 228352   ;;  %vm1623_vm14 = vcmask (!%p226_p9), 261120   ;;  %vm1676_vm15 = vcmask (!%p226_p9), 293888  }
  0x13   : > { %s3098_s11 = smov (!%p226_p9), 32   ;;  %vm1975_vm0 = vcmask (!%p226_p9), 57344  }
  0x17   : > { %s3186_s9 = scalar_select %p270_p10, %s3157_s25, 1 }
  0x19   : > { %s2921_s10 = smul.u32 216, %s3186_s9 }
  0x1b   : > { %s3192_s13 = scalar_lea.vmem %s4576_s0, %s2921_s10  ;;  %s3097_s10 = smov 28  }
  0x1c   : > { %v3195_v0 = vld [vmem:[%s3192_s13 + $0x18] sm:$0xf]  ;;  %v3198_v1 = vld [vmem:[%s3192_s13 + $0x1c] sm:$0xf]  ;;  %v289_v2 = vld [vmem:[%s3192_s13 + $0xc] sm:$0xf] }
  0x1d   : > { %v401_v3 = vshll.u32 %v3198_v1, 16  ;;  %v405_v4 = vshrl.u32 %v3198_v1, 16  ;;  %v3205_v5 = vcombine.low %v3195_v0, %v3198_v1  ;;  %v392_v6 = vshrl.u32 %v3195_v0, 16  ;;  %v3209_v7 = vld [vmem:[%s3192_s13 + $0x10] sm:$0xf] }
  0x1e   : > { %v395_v8 = vshll.u32 %v3195_v0, 16  ;;  %v377_v9 = vshll.u32 %v3209_v7, 16  ;;  %v381_v10 = vshrl.u32 %v3209_v7, 16  ;;  %v3215_v11 = vcombine.low %v289_v2, %v3209_v7  ;;  %v3218_v12 = vld [vmem:[%s3192_s13 + $0x14] sm:$0x1] }
  0x1f   : > { %v3220_v13 = vrot.slane %v401_v3, 5  ;;  %v3222_v14 = vrot.slane %v405_v4, 4  ;;  %1171 = vrot.lane.b32.xlu1 %v3205_v5, %s3091_s14  ;;  %v3226_v15 = vrot.slane %v392_v6, 4  ;;  %v368_v16 = vshrl.u32 %v289_v2, 16  ;;  %v3229_v17 = vld [vmem:[%s3192_s13] sm:$0xf] }
  0x20   : > { %v397_v18 = vrot.slane %v395_v8, 5  ;;  %v3231_v19 = vrot.slane %v381_v10, 4  ;;  %1169 = vrot.lane.b32.xlu0 %v3215_v11, %s3091_s14  ;;  %v371_v20 = vshll.u32 %v289_v2, 16  ;;  %v2697_v22 = vrot.slane %v289_v2, 9  ;;  %v3242_v23 = vld [vmem:[%s3192_s13 + $0x4] sm:$0xf] }
  0x21   : > { %v370_v24 = vrot.slane %v368_v16, 4  ;;  %v787_v25 = vrot.slane %v3209_v7, 5  ;;  %v790_v26 = vrot.slane %v3218_v12, 5  ;;  %v288_v27 = vld [vmem:[%s3192_s13 + $0x8] sm:$0x1]  ;;  %v2696_v28 = vrot.slane %v3229_v17, 9 }
  0x22   : > { %v373_v29 = vrot.slane %v371_v20, 5  ;;  %v780_v30 = vrot.slane %v3242_v23, 5  ;;  %v783_v31 = vrot.slane %v288_v27, 5  ;;  %v344_v32 = vshrl.u32 %v3229_v17, 16  ;;  %v294_v45 = vld [vmem:[%s3192_s13 + $0x20] sm:$0x1] }
  0x23   : > { %v788_v33 = vsel %vm3237_vm4, %v2697_v22, %v787_v25  ;;  %v789_v34 = vrot.slane %v787_v25, 4  ;;  %v347_v35 = vshll.u32 %v3229_v17, 16  ;;  %v353_v36 = vshll.u32 %v3242_v23, 16  ;;  %v3280_v8 = vld [vmem:[%s3192_s13 + $0x24] sm:$0xf] }
  0x24   : > { %v781_v37 = vsel %vm3237_vm4, %v2696_v28, %v780_v30  ;;  %v782_v38 = vrot.slane %v780_v30, 4  ;;  %v346_v39 = vrot.slane %v344_v32, 4  ;;  %v357_v40 = vshrl.u32 %v3242_v23, 16  ;;  %v3289_v16 = vld [vmem:[%s3192_s13 + $0x28] sm:$0xf] }
  0x25   : > { %v791_v41 = vsel %vm3237_vm4, %v789_v34, %v790_v26  ;;  %v349_v42 = vrot.slane %v347_v35, 5  ;;  %v355_v43 = vrot.slane %v353_v36, 5  ;;  %v363_v44 = vshll.u32 %v288_v27, 16  ;;  %v297_v28 = vld [vmem:[%s3192_s13 + $0x2c] sm:$0x1] }
  0x26   : > { %v2747_v46 = vcombine.low %v788_v33, %v791_v41  ;;  %v784_v47 = vsel %vm3237_vm4, %v782_v38, %v783_v31  ;;  %v359_v48 = vrot.slane %v357_v40, 4  ;;  %v411_v49 = vshll.u32 %v294_v45, 16 }
  0x27   : > { %v2746_v50 = vcombine.low %v781_v37, %v784_v47  ;;  %v350_v51 = vor.u32 %v349_v42, %v346_v39  ;;  %v365_v52 = vrot.slane %v363_v44, 5  ;;  %v2698_v53 = vrot.slane %v3195_v0, 9  ;;  %v2986_v39 = vld [vmem:[%s4577_s1 + $0x8] sm:$0xff]   ;;  %v298_v47 = vld [vmem:[%s3192_s13 + $0x30] sm:$0xf] }
  0x28   : > { %1239 = vrot.lane.b32.xlu0 %v2747_v46, %s3092_s15  ;;  %v360_v55 = vor.u32 %v359_v48, %v355_v43  ;;  %v413_v56 = vrot.slane %v411_v49, 5  ;;  %v794_v57 = vrot.slane %v3198_v1, 5  ;;  %v797_v58 = vrot.slane %v294_v45, 5  ;;  %v299_v49 = vld [vmem:[%s3192_s13 + $0x34] sm:$0xf] }
  0x29   : > { %1134 = vrot.lane.b32.xlu1 %v2746_v50, %s3093_s16  ;;  %v351_v59 = vrot.slane %v350_v51, 4  ;;  %v374_v60 = vor.u32 %v373_v29, %v370_v24  ;;  %v379_v61 = vrot.slane %v377_v9, 5  ;;  %v387_v62 = vshll.u32 %v3218_v12, 16  ;;  %v2984_v24 = vld [vmem:[%s4577_s1] sm:$0xff]  }
  0x2a   : > { %v361_v63 = vrot.slane %v360_v55, 4  ;;  %v795_v0 = vsel %vm3237_vm4, %v2698_v53, %v794_v57  ;;  %v796_v2 = vrot.slane %v794_v57, 4  ;;  %v398_v3 = vor.u32 %v397_v18, %v3226_v15  ;;  %2847 = vmatprep.subr.bf16.mxu0 %v2984_v24 }
  0x2b   : > { %v356_v1 = vsel %vm3266_vm5, %v351_v59, %v355_v43  ;;  %v375_v4 = vrot.slane %v374_v60, 4  ;;  %v384_v6 = vor.u32 %v3231_v19, %v379_v61  ;;  %v389_v7 = vrot.slane %v387_v62, 5  ;;  %2848 = vmatpush3.bf16.msra.mxu0 %v2984_v24 }
  0x2c   : > { %v366_v9 = vsel %vm3266_vm5, %v361_v63, %v365_v52  ;;  %v798_v10 = vsel %vm3237_vm4, %v796_v2, %v797_v58  ;;  %v399_v12 = vrot.slane %v398_v3, 4  ;;  %v408_v15 = vor.u32 %v3222_v14, %v3220_v13  ;;  %2849 = vmatprep.subr.bf16.mxu0 %v2986_v39 }
  0x2d   : > { %1136 = vrot.lane.b32.xlu1 %v2747_v46, %s3093_s16  ;;  %v2730_v18 = vcombine.low %v356_v1, %v366_v9  ;;  %v3292_v19 = vcombine.low %v795_v0, %v798_v10  ;;  %v380_v20 = vsel %vm3266_vm5, %v375_v4, %v379_v61  ;;  %v385_v22 = vrot.slane %v384_v6, 4  ;;  %v300_v0 = vld [vmem:[%s3192_s13 + $0x38] sm:$0x1]  ;;  %v3362_v9 = vld [vmem:[%s3192_s13 + $0x40] sm:$0xf] }
  0x2e   : > { %v404_v25 = vsel %vm3266_vm5, %v399_v12, %v3220_v13  ;;  %v409_v14 = vrot.slane %v408_v15, 4  ;;  %v416_v26 = vshrl.u32 %v3280_v8, 16  ;;  %v419_v27 = vshll.u32 %v3280_v8, 16 }
  0x2f   : > { %1054 = vrot.lane.b32.xlu0 %v2730_v18, %s3094_s19  ;;  %v390_v29 = vsel %vm3266_vm5, %v385_v22, %v389_v7  ;;  %v425_v30 = vshll.u32 %v3289_v16, 16  ;;  %v429_v31 = vshrl.u32 %v3289_v16, 16  ;;  %v435_v38 = vshll.u32 %v297_v28, 16  ;;  %2850 = vmatpush3.bf16.msra.mxu0 %v2986_v39  ;;  %v3357_v7 = vld [vmem:[%s3192_s13 + $0x3c] sm:$0xf] }
  0x30   : > { %v3310_v32 = vcombine.low %v380_v20, %v390_v29  ;;  %v414_v13 = vsel %vm3266_vm5, %v409_v14, %v413_v56  ;;  %v418_v33 = vrot.slane %v416_v26, 4  ;;  %v421_v34 = vrot.slane %v419_v27, 5 }
  0x31   : > { %1241 = vrot.lane.b32.xlu1 %v3292_v19, %s3092_s15  ;;  %v3316_v35 = vcombine.low %v404_v25, %v414_v13  ;;  %v427_v36 = vrot.slane %v425_v30, 5  ;;  %v431_v37 = vrot.slane %v429_v31, 4  ;;  %v437_v42 = vrot.slane %v435_v38, 5 }
  0x32   : > { %v422_v40 = vor.u32 %v421_v34, %v418_v33  ;;  %v3327_v44 = vcombine.low %v3280_v8, %v3289_v16  ;;  %v801_v50 = vrot.slane %v3289_v16, 5  ;;  %v440_v52 = vshrl.u32 %v298_v47, 16  ;;  %v303_v34 = vld [vmem:[%s3192_s13 + $0x44] sm:$0x1]  ;;  %2887 = vmatprep.mubr.msk.bf16.mxu1 %vm1376_vm6, %v3310_v32 }
  0x33   : > { %1056 = vrot.lane.b32.xlu0 %v3310_v32, %s3094_s19  ;;  %v432_v41 = vor.u32 %v431_v37, %v427_v36  ;;  %v443_v53 = vshll.u32 %v298_v47, 16  ;;  %v449_v55 = vshll.u32 %v299_v49, 16  ;;  %v453_v56 = vshrl.u32 %v299_v49, 16 }
  0x34   : > { %v423_v43 = vrot.slane %v422_v40, 4  ;;  %v2699_v57 = vrot.slane %v3280_v8, 9  ;;  %v803_v58 = vrot.slane %v801_v50, 4  ;;  %v804_v59 = vrot.slane %v297_v28, 5 }
  0x35   : > { %1206 = vrot.lane.b32.xlu1 %v3316_v35, %s3095_s28  ;;  %v433_v45 = vrot.slane %v432_v41, 4  ;;  %v442_v60 = vrot.slane %v440_v52, 4  ;;  %v445_v61 = vrot.slane %v443_v53, 5  ;;  %v451_v62 = vrot.slane %v449_v55, 5 }
  0x36   : > { %v428_v46 = vsel %vm3266_vm5, %v423_v43, %v427_v36  ;;  %v455_v63 = vrot.slane %v453_v56, 4  ;;  %v802_v2 = vsel %vm3237_vm4, %v2699_v57, %v801_v50  ;;  %v805_v3 = vsel %vm3237_vm4, %v803_v58, %v804_v59  ;;  %v3412_v50 = vld [vmem:[%s3192_s13 + $0x4c] sm:$0xf] }
  0x37   : > { %1204 = vrot.lane.b32.xlu0 %v3310_v32, %s3095_s28  ;;  %v438_v48 = vsel %vm3266_vm5, %v433_v45, %v437_v42  ;;  %v446_v1 = vor.u32 %v445_v61, %v442_v60  ;;  %v459_v4 = vshll.u32 %v300_v0, 16  ;;  %v2749_v8 = vcombine.low %v802_v2, %v805_v3 }
  0x38   : > { %v3340_v51 = vcombine.low %v428_v46, %v438_v48  ;;  %v456_v6 = vor.u32 %v455_v63, %v451_v62  ;;  %v808_v15 = vrot.slane %v299_v49, 5  ;;  %v464_v16 = vshrl.u32 %v3357_v7, 16 }
  0x39   : > { %1276 = vrot.lane.b32.xlu1 %v3327_v44, %s3096_s29  ;;  %v447_v10 = vrot.slane %v446_v1, 4  ;;  %v461_v12 = vrot.slane %v459_v4, 5  ;;  %v467_v20 = vshll.u32 %v3357_v7, 16  ;;  %v473_v22 = vshll.u32 %v3362_v9, 16  ;;  %v306_v1 = vld [vmem:[%s3192_s13 + $0x50] sm:$0x1] }
  0x3a   : > { %v457_v18 = vrot.slane %v456_v6, 4  ;;  %v477_v24 = vshrl.u32 %v3362_v9, 16  ;;  %v3371_v25 = vcombine.low %v298_v47, %v299_v49  ;;  %v2700_v14 = vrot.slane %v298_v47, 9  ;;  %v3408_v49 = vld [vmem:[%s3192_s13 + $0x48] sm:$0xf] }
  0x3b   : > { %1274 = vrot.lane.b32.xlu0 %v3205_v5, %s3096_s29  ;;  %v452_v26 = vsel %vm3266_vm5, %v447_v10, %v451_v62  ;;  %v810_v27 = vrot.slane %v808_v15, 4  ;;  %v811_v28 = vrot.slane %v300_v0, 5  ;;  %v466_v29 = vrot.slane %v464_v16, 4  ;;  %v2987_v62 = vld [vmem:[%s4577_s1 + $0x10] ss:$0 sps:$4 sm:$0x33]  }
  0x3c   : > { %v462_v30 = vsel %vm3266_vm5, %v457_v18, %v461_v12  ;;  %v469_v31 = vrot.slane %v467_v20, 5  ;;  %v475_v13 = vrot.slane %v473_v22, 5  ;;  %v479_v33 = vrot.slane %v477_v24, 4  ;;  %2919 = vmatprep.subr.msk.bf16.mxu0 %vm1709_vm7, %v2987_v62  ;;  %v3446_v10 = vld [vmem:[%s3192_s13 + $0x54] sm:$0xf] }
  0x3d   : > { %1311 = vrot.lane.b32.xlu1 %v3340_v51, %s3097_s10  ;;  %v3383_v36 = vcombine.low %v452_v26, %v462_v30  ;;  %v809_v37 = vsel %vm3237_vm4, %v2700_v14, %v808_v15  ;;  %v812_v38 = vsel %vm3237_vm4, %v810_v27, %v811_v28  ;;  %v483_v41 = vshll.u32 %v303_v34, 16  ;;  %v3452_v16 = vld [vmem:[%s3192_s13 + $0x58] sm:$0xf] }
  0x3e   : > { %v470_v39 = vor.u32 %v469_v31, %v466_v29  ;;  %v480_v40 = vor.u32 %v479_v33, %v475_v13  ;;  %v3401_v46 = vcombine.low %v3357_v7, %v3362_v9  ;;  %v2714_v52 = vcombine.low %v3229_v17, %v3242_v23 }
  0x3f   : > { %1309 = vrot.lane.b32.xlu0 %v3316_v35, %s3097_s10  ;;  %v485_v45 = vrot.slane %v483_v41, 5  ;;  %v815_v53 = vrot.slane %v3362_v9, 5  ;;  %v488_v56 = vshrl.u32 %v3408_v49, 16  ;;  %v491_v57 = vshll.u32 %v3408_v49, 16  ;;  %v309_v41 = vld [vmem:[%s3192_s13 + $0x5c] sm:$0x1] }
  0x40   : > { %v471_v42 = vrot.slane %v470_v39, 4  ;;  %v481_v43 = vrot.slane %v480_v40, 4  ;;  %v497_v58 = vshll.u32 %v3412_v50, 16  ;;  %v501_v59 = vshrl.u32 %v3412_v50, 16 }
  0x41   : > { %1058 = vrot.lane.b32.xlu1 %v3316_v35, %s3094_s19  ;;  %v2701_v60 = vrot.slane %v3357_v7, 9  ;;  %v817_v32 = vrot.slane %v815_v53, 4  ;;  %v818_v61 = vrot.slane %v303_v34, 5  ;;  %v490_v63 = vrot.slane %v488_v56, 4 }
  0x42   : > { %v476_v47 = vsel %vm3266_vm5, %v471_v42, %v475_v13  ;;  %v486_v48 = vsel %vm3266_vm5, %v481_v43, %v485_v45  ;;  %v493_v0 = vrot.slane %v491_v57, 5  ;;  %v499_v2 = vrot.slane %v497_v58, 5 }
  0x43   : > { %1344 = vrot.lane.b32.xlu0 %v3292_v19, %s3098_s11  ;;  %v3421_v55 = vcombine.low %v476_v47, %v486_v48  ;;  %v503_v3 = vrot.slane %v501_v59, 4  ;;  %v816_v4 = vsel %vm3237_vm4, %v2701_v60, %v815_v53  ;;  %v819_v6 = vsel %vm3237_vm4, %v817_v32, %v818_v61  ;;  %v310_v60 = vld [vmem:[%s3192_s13 + $0x60] sm:$0xf]  ;;  %v311_v32 = vld [vmem:[%s3192_s13 + $0x64] sm:$0xf] }
  0x44   : > { %v494_v7 = vor.u32 %v493_v0, %v490_v63  ;;  %v1711_v12 = vsel %vm1709_vm7, %v2987_v62, 0  ;;  %v2751_v15 = vcombine.low %v816_v4, %v819_v6  ;;  %v822_v22 = vrot.slane %v3412_v50, 5 }
  0x45   : > { %1060 = vrot.lane.b32.xlu1 %v3340_v51, %s3094_s19  ;;  %v504_v9 = vor.u32 %v503_v3, %v499_v2  ;;  %2852 = vmatpush3.bf16.msra.mxu0 %v1711_v12  ;;  %v512_v24 = vshrl.u32 %v3446_v10, 16  ;;  %v515_v26 = vshll.u32 %v3446_v10, 16  ;;  %v521_v27 = vshll.u32 %v3452_v16, 16 }
  0x46   : > { %v495_v18 = vrot.slane %v494_v7, 4  ;;  %v525_v28 = vshrl.u32 %v3452_v16, 16  ;;  %v3464_v29 = vcombine.low %v3408_v49, %v3412_v50  ;;  %v2702_v30 = vrot.slane %v3408_v49, 9 }
  0x47   : > { %1346 = vrot.lane.b32.xlu0 %v2749_v8, %s3098_s11  ;;  %v505_v14 = vrot.slane %v504_v9, 4  ;;  %v824_v13 = vrot.slane %v822_v22, 4  ;;  %v825_v33 = vrot.slane %v306_v1, 5  ;;  %v514_v34 = vrot.slane %v512_v24, 4  ;;  %v3521_v24 = vld [vmem:[%s3192_s13 + $0x6c] sm:$0xf] }
  0x48   : > { %v500_v31 = vsel %vm3266_vm5, %v495_v18, %v499_v2  ;;  %v523_v39 = vrot.slane %v521_v27, 5  ;;  %v527_v40 = vrot.slane %v525_v28, 4  ;;  %v823_v43 = vsel %vm3237_vm4, %v2702_v30, %v822_v22 }
  0x49   : > { %1140 = vrot.lane.b32.xlu1 %v2749_v8, %s3093_s16  ;;  %v826_v45 = vsel %vm3237_vm4, %v824_v13, %v825_v33  ;;  %v531_v49 = vshll.u32 %v309_v41, 16  ;;  %v3492_v57 = vcombine.low %v3446_v10, %v3452_v16  ;;  %v829_v61 = vrot.slane %v3452_v16, 5 }
  0x4a   : > { %v528_v48 = vor.u32 %v527_v40, %v523_v39  ;;  %v536_v63 = vshrl.u32 %v310_v60, 16  ;;  %v539_v0 = vshll.u32 %v310_v60, 16  ;;  %v545_v2 = vshll.u32 %v311_v32, 16 }
  0x4b   : > { %1138 = vrot.lane.b32.xlu0 %v3292_v19, %s3093_s16  ;;  %v3393_v19 = vcombine.low %v809_v37, %v812_v38  ;;  %v517_v38 = vrot.slane %v515_v26, 5  ;;  %v533_v56 = vrot.slane %v531_v49, 5  ;;  %v549_v3 = vshrl.u32 %v311_v32, 16  ;;  %v3525_v26 = vld [vmem:[%s3192_s13 + $0x70] sm:$0xf] }
  0x4c   : > { %v529_v53 = vrot.slane %v528_v48, 4  ;;  %v831_v4 = vrot.slane %v829_v61, 4  ;;  %v832_v6 = vrot.slane %v309_v41, 5  ;;  %v538_v7 = vrot.slane %v536_v63, 4 }
  0x4d   : > { %1175 = vrot.lane.b32.xlu1 %v3371_v25, %s3091_s14  ;;  %v518_v47 = vor.u32 %v517_v38, %v514_v34  ;;  %v547_v9 = vrot.slane %v545_v2, 5  ;;  %v551_v12 = vrot.slane %v549_v3, 4  ;;  %v836_v30 = vrot.slane %v311_v32, 5 }
  0x4e   : > { %v534_v59 = vsel %vm3266_vm5, %v529_v53, %v533_v56  ;;  %v563_v33 = vshll.u32 %v3521_v24, 16  ;;  %v569_v34 = vshll.u32 %v3525_v26, 16  ;;  %v3534_v38 = vcombine.low %v310_v60, %v311_v32  ;;  %v315_v53 = vld [vmem:[%s3192_s13 + $0x74] sm:$0x1] }
  0x4f   : > { %1173 = vrot.lane.b32.xlu0 %v3327_v44, %s3091_s14  ;;  %v519_v50 = vrot.slane %v518_v47, 4  ;;  %v552_v22 = vor.u32 %v551_v12, %v547_v9  ;;  %v838_v41 = vrot.slane %v836_v30, 4  ;;  %v843_v12 = vrot.slane %v3525_v26, 5 }
  0x50   : > { %v565_v48 = vrot.slane %v563_v33, 5  ;;  %v571_v49 = vrot.slane %v569_v34, 5  ;;  %v318_v34 = vld [vmem:[%s3192_s13 + $0x80] sm:$0x1] }
  0x51   : > { %1210 = vrot.lane.b32.xlu1 %v3383_v36, %s3095_s28  ;;  %v524_v58 = vsel %vm3266_vm5, %v519_v50, %v523_v39  ;;  %v553_v13 = vrot.slane %v552_v22, 4  ;;  %v2704_v39 = vrot.slane %v310_v60, 9 }
  0x52   : > { %v3504_v62 = vcombine.low %v524_v58, %v534_v59 }
  0x53   : > { %1208 = vrot.lane.b32.xlu0 %v3340_v51, %s3095_s28  ;;  %v837_v58 = vsel %vm3237_vm4, %v2704_v39, %v836_v30 }
  0x55   : > { %1245 = vrot.lane.b32.xlu1 %v3393_v19, %s3092_s15 }
  0x57   : > { %1243 = vrot.lane.b32.xlu0 %v2749_v8, %s3092_s15  ;;  %v507_v8 = vshll.u32 %v306_v1, 16  ;;  %v2703_v1 = vrot.slane %v3446_v10, 9  ;;  %v833_v10 = vsel %vm3237_vm4, %v831_v4, %v832_v6  ;;  %v3567_v4 = vcombine.low %v3521_v24, %v3525_v26  ;;  %v3570_v6 = vld [vmem:[%s3192_s13 + $0x78] sm:$0xf] }
  0x59   : > { %1280 = vrot.lane.b32.xlu1 %v3401_v46, %s3096_s29  ;;  %v509_v20 = vrot.slane %v507_v8, 5  ;;  %v541_v8 = vrot.slane %v539_v0, 5  ;;  %v830_v16 = vsel %vm3237_vm4, %v2703_v1, %v829_v61  ;;  %v579_v61 = vshll.u32 %v315_v53, 16 }
  0x5b   : > { %1278 = vrot.lane.b32.xlu0 %v3371_v25, %s3096_s29  ;;  %v510_v37 = vsel %vm3266_vm5, %v505_v14, %v509_v20  ;;  %v542_v18 = vor.u32 %v541_v8, %v538_v7  ;;  %v2753_v14 = vcombine.low %v830_v16, %v833_v10  ;;  %v581_v2 = vrot.slane %v579_v61, 5 }
  0x5c   : > { %v3477_v42 = vcombine.low %v500_v31, %v510_v37  ;;  %v560_v31 = vshrl.u32 %v3521_v24, 16  ;;  %v573_v37 = vshrl.u32 %v3525_v26, 16  ;;  %v587_v10 = vshll.u32 %v3570_v6, 16 }
  0x5d   : > { %1315 = vrot.lane.b32.xlu1 %v3421_v55, %s3097_s10  ;;  %v543_v27 = vrot.slane %v542_v18, 4  ;;  %v2705_v26 = vrot.slane %v3521_v24, 9 }
  0x5e   : > { %v575_v50 = vrot.slane %v573_v37, 4 }
  0x5f   : > { %1313 = vrot.lane.b32.xlu0 %v3383_v36, %s3097_s10  ;;  %v548_v40 = vsel %vm3266_vm5, %v543_v27, %v547_v9  ;;  %v3577_v9 = vld [vmem:[%s3192_s13 + $0x7c] sm:$0xf]  ;;  %v845_v27 = vrot.slane %v843_v12, 4  ;;  %v844_v39 = vsel %vm3237_vm4, %v2705_v26, %v843_v12  ;;  %v2706_v12 = vrot.slane %v3570_v6, 9 }
  0x60   : > { %v576_v32 = vor.u32 %v575_v50, %v571_v49  ;;  %v593_v18 = vshll.u32 %v3577_v9, 16  ;;  %v3615_v50 = vld [vmem:[%s3192_s13 + $0x88] sm:$0xf] }
  0x61   : > { %1062 = vrot.lane.b32.xlu1 %v3383_v36, %s3094_s19 }
  0x62   : > { %v577_v0 = vrot.slane %v576_v32, 4  ;;  %v850_v32 = vrot.slane %v3577_v9, 5 }
  0x63   : > { %1348 = vrot.lane.b32.xlu0 %v3393_v19, %s3098_s11 }
  0x64   : > { %v582_v8 = vsel %vm3266_vm5, %v577_v0, %v581_v2  ;;  %v617_v0 = vshll.u32 %v3615_v50, 16  ;;  %v621_v2 = vshrl.u32 %v3615_v50, 16  ;;  %v852_v26 = vrot.slane %v850_v32, 4 }
  0x65   : > { %1064 = vrot.lane.b32.xlu1 %v3421_v55, %s3094_s19 }
  0x67   : > { %1350 = vrot.lane.b32.xlu0 %v2751_v15, %s3098_s11 }
  0x69   : > { %1144 = vrot.lane.b32.xlu1 %v2751_v15, %s3093_s16 }
  0x6b   : > { %1142 = vrot.lane.b32.xlu0 %v3393_v19, %s3093_s16  ;;  %v2752_v19 = vcombine.low %v823_v43, %v826_v45  ;;  %v562_v45 = vrot.slane %v560_v31, 4  ;;  %v589_v31 = vrot.slane %v587_v10, 5 }
  0x6d   : > { %1179 = vrot.lane.b32.xlu1 %v3464_v29, %s3091_s14  ;;  %v566_v60 = vor.u32 %v565_v48, %v562_v45  ;;  %v603_v45 = vshll.u32 %v318_v34, 16 }
  0x6f   : > { %1177 = vrot.lane.b32.xlu0 %v3401_v46, %s3091_s14  ;;  %v567_v63 = vrot.slane %v566_v60, 4  ;;  %v605_v60 = vrot.slane %v603_v45, 5 }
  0x71   : > { %1214 = vrot.lane.b32.xlu1 %v3477_v42, %s3095_s28  ;;  %v572_v7 = vsel %vm3266_vm5, %v567_v63, %v571_v49  ;;  %v3612_v49 = vld [vmem:[%s3192_s13 + $0x84] sm:$0xf] }
  0x72   : > { %v3584_v16 = vcombine.low %v572_v7, %v582_v8  ;;  %v608_v61 = vshrl.u32 %v3612_v49, 16  ;;  %v611_v63 = vshll.u32 %v3612_v49, 16  ;;  %v3628_v8 = vcombine.low %v3570_v6, %v3577_v9 }
  0x73   : > { %1212 = vrot.lane.b32.xlu0 %v3421_v55, %s3095_s28 }
  0x75   : > { %1249 = vrot.lane.b32.xlu1 %v2752_v19, %s3092_s15 }
  0x77   : > { %1247 = vrot.lane.b32.xlu0 %v2751_v15, %s3092_s15  ;;  %v312_v15 = vld [vmem:[%s3192_s13 + $0x68] sm:$0x1] }
  0x78   : > { %v555_v20 = vshll.u32 %v312_v15, 16  ;;  %v839_v43 = vrot.slane %v312_v15, 5  ;;  %v584_v15 = vshrl.u32 %v3570_v6, 16  ;;  %v619_v6 = vrot.slane %v617_v0, 5 }
  0x79   : > { %1284 = vrot.lane.b32.xlu1 %v3492_v57, %s3096_s29 }
  0x7a   : > { %v557_v28 = vrot.slane %v555_v20, 5  ;;  %v840_v59 = vsel %vm3237_vm4, %v838_v41, %v839_v43  ;;  %v597_v20 = vshrl.u32 %v3577_v9, 16  ;;  %v586_v30 = vrot.slane %v584_v15, 4 }
  0x7b   : > { %1282 = vrot.lane.b32.xlu0 %v3464_v29, %s3096_s29  ;;  %v853_v15 = vrot.slane %v318_v34, 5  ;;  %v851_v34 = vsel %vm3237_vm4, %v2706_v12, %v850_v32 }
  0x7c   : > { %v558_v47 = vsel %vm3266_vm5, %v553_v13, %v557_v28  ;;  %v846_v28 = vrot.slane %v315_v53, 5  ;;  %v595_v13 = vrot.slane %v593_v18, 5  ;;  %v599_v33 = vrot.slane %v597_v20, 4 }
  0x7d   : > { %1319 = vrot.lane.b32.xlu1 %v3504_v62, %s3097_s10  ;;  %v3545_v56 = vcombine.low %v548_v40, %v558_v47  ;;  %v590_v41 = vor.u32 %v589_v31, %v586_v30  ;;  %v623_v30 = vrot.slane %v621_v2, 4 }
  0x7e   : > { %v847_v24 = vsel %vm3237_vm4, %v845_v27, %v846_v28  ;;  %v600_v43 = vor.u32 %v599_v33, %v595_v13  ;;  %v610_v27 = vrot.slane %v608_v61, 4  ;;  %v613_v28 = vrot.slane %v611_v63, 5 }
  0x7f   : > { %1317 = vrot.lane.b32.xlu0 %v3477_v42, %s3097_s10  ;;  %v3609_v48 = vcombine.low %v844_v39, %v847_v24  ;;  %v624_v24 = vor.u32 %v623_v30, %v619_v6 }
  0x80   : > { %v614_v39 = vor.u32 %v613_v28, %v610_v27 }
  0x81   : > { %1066 = vrot.lane.b32.xlu1 %v3477_v42, %s3094_s19 }
  0x83   : > { %1352 = vrot.lane.b32.xlu0 %v2752_v19, %s3098_s11 }
  0x85   : > { %1068 = vrot.lane.b32.xlu1 %v3504_v62, %s3094_s19 }
  0x87   : > { %1354 = vrot.lane.b32.xlu0 %v2753_v14, %s3098_s11 }
  0x89   : > { %1148 = vrot.lane.b32.xlu1 %v2753_v14, %s3093_s16 }
  0x8b   : > { %1146 = vrot.lane.b32.xlu0 %v2752_v19, %s3093_s16  ;;  %v3555_v19 = vcombine.low %v837_v58, %v840_v59  ;;  %v591_v58 = vrot.slane %v590_v41, 4  ;;  %v601_v59 = vrot.slane %v600_v43, 4 }
  0x8d   : > { %1183 = vrot.lane.b32.xlu1 %v3534_v38, %s3091_s14  ;;  %v596_v20 = vsel %vm3266_vm5, %v591_v58, %v595_v13  ;;  %v606_v9 = vsel %vm3266_vm5, %v601_v59, %v605_v60  ;;  %v615_v58 = vrot.slane %v614_v39, 4 }
  0x8e   : > { %v3651_v33 = vcombine.low %v596_v20, %v606_v9  ;;  %v3701_v20 = vld [vmem:[%s3192_s13 + $0x94] sm:$0xf] }
  0x8f   : > { %1181 = vrot.lane.b32.xlu0 %v3492_v57, %s3091_s14  ;;  %v620_v12 = vsel %vm3266_vm5, %v615_v58, %v619_v6 }
  0x91   : > { %1218 = vrot.lane.b32.xlu1 %v3545_v56, %s3095_s28  ;;  %v3561_v3 = vpop.permute.xlu1 %1171 }
  0x92   : > { %v3563_v1 = vpop.permute.xlu0 %1169 }
  0x93   : > { %1216 = vrot.lane.b32.xlu0 %v3504_v62, %s3095_s28 }
  0x95   : > { %1253 = vrot.lane.b32.xlu1 %v3555_v19, %s3092_s15 }
  0x97   : > { %1251 = vrot.lane.b32.xlu0 %v2753_v14, %s3092_s15 }
  0x99   : > { %1288 = vrot.lane.b32.xlu1 %v3567_v4, %s3096_s29 }
  0x9a   : > { %v3591_v22 = vpop.permute.xlu0 %1239 }
  0x9b   : > { %1286 = vrot.lane.b32.xlu0 %v3534_v38, %s3096_s29  ;;  %v1135_v14 = vpop.permute.xlu1 %1134 }
  0x9d   : > { %1323 = vrot.lane.b32.xlu1 %v3584_v16, %s3097_s10 }
  0x9f   : > { %1321 = vrot.lane.b32.xlu0 %v3545_v56, %s3097_s10  ;;  %v1137_v37 = vpop.permute.xlu1 %1136 }
  0xa1   : > { %v1055_v40 = vpop.permute.xlu0 %1054  ;;  %1070 = vrot.lane.b32.xlu1 %v3545_v56, %s3094_s19 }
  0xa2   : > { %v1379_v10 = vsel %vm1376_vm6, %v2714_v52, %v1055_v40  ;;  %v3646_v52 = vld [vmem:[%s3192_s13 + $0x8c] sm:$0x1] }
  0xa3   : > { %1356 = vrot.lane.b32.xlu0 %v3555_v19, %s3098_s11  ;;  %v3607_v47 = vpop.permute.xlu1 %1241  ;;  %v1427_v31 = vsel %vm1425_vm8, %v1379_v10, %v1135_v14  ;;  %v627_v14 = vshll.u32 %v3646_v52, 16 }
  0xa4   : > { %v1460_v40 = vsel %vm1458_vm9, %v1427_v31, %v3563_v1  ;;  %v625_v1 = vrot.slane %v624_v24, 4  ;;  %v2707_v31 = vrot.slane %v3612_v49, 9 }
  0xa5   : > { %v1057_v53 = vpop.permute.xlu0 %1056  ;;  %1072 = vrot.lane.b32.xlu1 %v3584_v16, %s3094_s19  ;;  %v629_v59 = vrot.slane %v627_v14, 5 }
  0xa6   : > { %v1382_v17 = vsel %vm1376_vm6, %v3215_v11, %v1057_v53  ;;  %v854_v11 = vsel %vm3237_vm4, %v852_v26, %v853_v15  ;;  %v3691_v15 = vld [vmem:[%s3192_s13 + $0x90] sm:$0xf]  ;;  %v857_v26 = vrot.slane %v3615_v50, 5 }
  0xa7   : > { %1358 = vrot.lane.b32.xlu0 %v3609_v48, %s3098_s11  ;;  %v1207_v7 = vpop.permute.xlu1 %1206  ;;  %v635_v6 = vshll.u32 %v3691_v15, 16 }
  0xa9   : > { %v1205_v18 = vpop.permute.xlu0 %1204  ;;  %1152 = vrot.lane.b32.xlu1 %v3609_v48, %s3093_s16  ;;  %v637_v39 = vrot.slane %v635_v6, 5 }
  0xaa   : > { %v1493_v43 = vsel %vm1491_vm10, %v1460_v40, %v1205_v18  ;;  %v324_v40 = vld [vmem:[%s3192_s13 + $0x98] sm:$0x1] }
  0xab   : > { %1150 = vrot.lane.b32.xlu0 %v3555_v19, %s3093_s16  ;;  %v1277_v23 = vpop.permute.xlu1 %1276  ;;  %v1429_v19 = vsel %vm1425_vm8, %v1382_v17, %v1137_v37  ;;  %v3668_v37 = vcombine.low %v851_v34, %v854_v11  ;;  %v1526_v60 = vsel %vm1524_vm11, %v1493_v43, %v3591_v22  ;;  %v3683_v22 = vcombine.low %v3612_v49, %v3615_v50 }
  0xac   : > { %v1462_v45 = vsel %vm1458_vm9, %v1429_v19, %v3561_v3  ;;  %v641_v17 = vshll.u32 %v3701_v20, 16  ;;  %v860_v34 = vrot.slane %v3646_v52, 5  ;;  %v858_v49 = vsel %vm3237_vm4, %v2707_v31, %v857_v26 }
  0xad   : > { %v1275_v13 = vpop.permute.xlu0 %1274  ;;  %1187 = vrot.lane.b32.xlu1 %v3628_v8, %s3091_s14  ;;  %v1495_v3 = vsel %vm1491_vm10, %v1462_v45, %v1207_v7  ;;  %v630_v7 = vsel %vm3266_vm5, %v625_v1, %v629_v59  ;;  %v3738_v1 = vld [vmem:[%s3192_s13 + $0x9c] sm:$0xf] }
  0xae   : > { %v1559_v61 = vsel %vm1557_vm12, %v1526_v60, %v1275_v13  ;;  %v1528_v10 = vsel %vm1524_vm11, %v1495_v3, %v3607_v47  ;;  %v3708_v47 = vcombine.low %v620_v12, %v630_v7  ;;  %v859_v13 = vrot.slane %v857_v26, 4  ;;  %v3747_v3 = vld [vmem:[%s3192_s13 + $0xa0] sm:$0xf] }
  0xaf   : > { %1185 = vrot.lane.b32.xlu0 %v3567_v4, %s3091_s14  ;;  %v1312_v41 = vpop.permute.xlu1 %1311  ;;  %v1561_v9 = vsel %vm1557_vm12, %v1528_v10, %v1277_v23  ;;  %v645_v23 = vshrl.u32 %v3701_v20, 16  ;;  %v643_v24 = vrot.slane %v641_v17, 5  ;;  %v656_v12 = vshrl.u32 %v3738_v1, 16 }
  0xb0   : > { %v1594_v27 = vsel %vm1590_vm13, %v1561_v9, %v1312_v41  ;;  %v861_v52 = vsel %vm3237_vm4, %v859_v13, %v860_v34  ;;  %v659_v10 = vshll.u32 %v3738_v1, 16  ;;  %v665_v9 = vshll.u32 %v3747_v3, 16 }
  0xb1   : > { %v1310_v53 = vpop.permute.xlu0 %1309  ;;  %1222 = vrot.lane.b32.xlu1 %v3651_v33, %s3095_s28  ;;  %v647_v14 = vrot.slane %v645_v23, 4  ;;  %v3744_v60 = vcombine.low %v858_v49, %v861_v52  ;;  %v669_v26 = vshrl.u32 %v3747_v3, 16  ;;  %v867_v23 = vrot.slane %v324_v40, 5 }
  0xb2   : > { %v1592_v63 = vsel %vm1590_vm13, %v1559_v61, %v1310_v53  ;;  %v651_v53 = vshll.u32 %v324_v40, 16  ;;  %v658_v31 = vrot.slane %v656_v12, 4  ;;  %v661_v34 = vrot.slane %v659_v10, 5 }
  0xb3   : > { %1220 = vrot.lane.b32.xlu0 %v3584_v16, %s3095_s28  ;;  %v3674_v32 = vpop.permute.xlu1 %1058  ;;  %v648_v58 = vor.u32 %v647_v14, %v643_v24 }
  0xb4   : > { %v662_v52 = vor.u32 %v661_v34, %v658_v31 }
  0xb5   : > { %v1345_v0 = vpop.permute.xlu0 %1344  ;;  %1257 = vrot.lane.b32.xlu1 %v3668_v37, %s3092_s15  ;;  %v649_v7 = vrot.slane %v648_v58, 4  ;;  %v1385_v58 = vsel %vm1376_vm6, %v3205_v5, %v3674_v32 }
  0xb6   : > { %v1625_v2 = vsel %vm1623_vm14, %v1592_v63, %v1345_v0  ;;  %v653_v0 = vrot.slane %v651_v53, 5  ;;  %v663_v32 = vrot.slane %v662_v52, 4 }
  0xb7   : > { %1255 = vrot.lane.b32.xlu0 %v3609_v48, %s3092_s15  ;;  %2853 = vmatprep.mubr.msk.bf16.mxu0 %vm1676_vm15, %v1625_v2  ;;  %v3698_v18 = vpop.permute.xlu1 %1060  ;;  %v632_v48 = vshrl.u32 %v3691_v15, 16  ;;  %v864_v2 = vrot.slane %v3701_v20, 5 }
  0xb8   : > { %v654_v13 = vsel %vm3266_vm5, %v649_v7, %v653_v0 }
  0xb9   : > { %v1347_v28 = vpop.permute.xlu0 %1346  ;;  %1292 = vrot.lane.b32.xlu1 %v3683_v22, %s3096_s29  ;;  %v634_v19 = vrot.slane %v632_v48, 4  ;;  %v2708_v48 = vrot.slane %v3691_v15, 9  ;;  %v866_v17 = vrot.slane %v864_v2, 4 }
  0xba   : > { %v1627_v30 = vsel %vm1623_vm14, %v1594_v27, %v1347_v28  ;;  %v3760_v28 = vcombine.low %v3691_v15, %v3701_v20  ;;  %v3772_v20 = vld [vmem:[%s3192_s13 + $0xa4] sm:$0x1] }
  0xbb   : > { %1290 = vrot.lane.b32.xlu0 %v3628_v8, %s3096_s29  ;;  %2854 = vmatmul.mubr.msk.bf16.vlgmr.msra.gmra.mrb[0].mxu0 %vm1676_vm15, %v1627_v30  ;;  %v3718_v50 = vpop.permute.xlu1 %1140  ;;  %v638_v45 = vor.u32 %v637_v39, %v634_v19  ;;  %v667_v19 = vrot.slane %v665_v9, 5  ;;  %v671_v39 = vrot.slane %v669_v26, 4  ;;  %v865_v40 = vsel %vm3237_vm4, %v2708_v48, %v864_v2 }
  0xbc   : > { %v868_v49 = vsel %vm3237_vm4, %v866_v17, %v867_v23  ;;  %v675_v53 = vshll.u32 %v3772_v20, 16  ;;  %v1388_v48 = vsel %vm1376_vm6, %v3327_v44, %v3698_v18  ;;  %v3833_v23 = vld [vmem:[%s3192_s13 + $0xa8] sm:$0xf] }
  0xbd   : > { %v3722_v11 = vpop.permute.xlu0 %1138  ;;  %1327 = vrot.lane.b32.xlu1 %v3708_v47, %s3097_s10  ;;  %v639_v63 = vrot.slane %v638_v45, 4  ;;  %v672_v45 = vor.u32 %v671_v39, %v667_v19  ;;  %v3798_v10 = vcombine.low %v865_v40, %v868_v49  ;;  %v683_v49 = vshll.u32 %v3833_v23, 16 }
  0xbe   : > { %v1431_v2 = vsel %vm1425_vm8, %v1385_v58, %v3722_v11  ;;  %v677_v26 = vrot.slane %v675_v53, 5 }
  0xbf   : > { %1325 = vrot.lane.b32.xlu0 %v3651_v33, %s3097_s10  ;;  %v3729_v41 = vpop.permute.xlu1 %1175  ;;  %v644_v30 = vsel %vm3266_vm5, %v639_v63, %v643_v24  ;;  %v673_v9 = vrot.slane %v672_v45, 4  ;;  %v2709_v45 = vrot.slane %v3738_v1, 9 }
  0xc0   : > { %v3776_v24 = vcombine.low %v644_v30, %v654_v13 }
  0xc1   : > { %v1174_v43 = vpop.permute.xlu0 %1173  ;;  %1074 = vrot.lane.b32.xlu1 %v3651_v33, %s3094_s19 }
  0xc2   : > { %v1464_v12 = vsel %vm1458_vm9, %v1431_v2, %v1174_v43  ;;  %v685_v2 = vrot.slane %v683_v49, 5 }
  0xc3   : > { %1360 = vrot.lane.b32.xlu0 %v3668_v37, %s3098_s11  ;;  %v3742_v59 = vpop.permute.xlu1 %1210 }
  0xc5   : > { %v1209_v61 = vpop.permute.xlu0 %1208  ;;  %1076 = vrot.lane.b32.xlu1 %v3708_v47, %s3094_s19 }
  0xc6   : > { %v1497_v5 = vsel %vm1491_vm10, %v1464_v12, %v1209_v61  ;;  %v1433_v61 = vsel %vm1425_vm8, %v1388_v48, %v3718_v50 }
  0xc7   : > { %1362 = vrot.lane.b32.xlu0 %v3744_v60, %s3098_s11  ;;  %v1246_v27 = vpop.permute.xlu1 %1245  ;;  %v1466_v44 = vsel %vm1458_vm9, %v1433_v61, %v3729_v41  ;;  %v678_v41 = vsel %vm3266_vm5, %v673_v9, %v677_v26  ;;  %v3883_v26 = vld [vmem:[%s3192_s13 + $0xb4] sm:$0xf]  ;;  %v3892_v61 = vld [vmem:[%s3192_s13 + $0xb8] sm:$0xf] }
  0xc8   : > { %v1499_v50 = vsel %vm1491_vm10, %v1466_v44, %v3742_v59  ;;  %v3842_v59 = vld [vmem:[%s3192_s13 + $0xac] sm:$0xf] }
  0xc9   : > { %v1244_v6 = vpop.permute.xlu0 %1243  ;;  %1156 = vrot.lane.b32.xlu1 %v3744_v60, %s3093_s16  ;;  %v1532_v31 = vsel %vm1524_vm11, %v1499_v50, %v1246_v27  ;;  %v693_v52 = vshrl.u32 %v3842_v59, 16  ;;  %v707_v50 = vshll.u32 %v3883_v26, 16 }
  0xca   : > { %v1530_v11 = vsel %vm1524_vm11, %v1497_v5, %v1244_v6 }
  0xcb   : > { %1154 = vrot.lane.b32.xlu0 %v3668_v37, %s3093_s16  ;;  %v1281_v15 = vpop.permute.xlu1 %1280  ;;  %v2079_v37 = vld [vmem:[%s4578_s2] sm:$0x3]  ;;  %v695_v12 = vrot.slane %v693_v52, 4 }
  0xcc   : > { %2920 = vmatprep.subr.msk.bf16.mxu1 %vm1709_vm7, %v2079_v37  ;;  %v2129_v0 = vsel %vm1709_vm7, %v2079_v37, 0  ;;  %v1565_v34 = vsel %vm1557_vm12, %v1532_v31, %v1281_v15  ;;  %v689_v15 = vshll.u32 %v3842_v59, 16  ;;  %v874_v37 = vrot.slane %v3772_v20, 5 }
  0xcd   : > { %v1279_v14 = vpop.permute.xlu0 %1278  ;;  %1191 = vrot.lane.b32.xlu1 %v3760_v28, %s3091_s14  ;;  %2886 = vmatpush3.bf16.msra.mxu1 %v2129_v0 }
  0xce   : > { %v1563_v30 = vsel %vm1557_vm12, %v1530_v11, %v1279_v14 }
  0xcf   : > { %1189 = vrot.lane.b32.xlu0 %v3683_v22, %s3091_s14  ;;  %v1316_v63 = vpop.permute.xlu1 %1315 }
  0xd0   : > { %2888 = vmatmul.mubr.msk.bf16.vlgmr.msra.gmra.mrb[0].mxu1 %vm1376_vm6, %v3316_v35  ;;  %v3823_v35 = vcombine.low %v3738_v1, %v3747_v3  ;;  %v1598_v39 = vsel %vm1590_vm13, %v1565_v34, %v1316_v63  ;;  %v330_v63 = vld [vmem:[%s3192_s13 + $0xb0] sm:$0x1]  ;;  %v691_v1 = vrot.slane %v689_v15, 5  ;;  %v3909_v34 = vcombine.low %v3833_v23, %v3842_v59 }
  0xd1   : > { %v1314_v7 = vpop.permute.xlu0 %1313  ;;  %1226 = vrot.lane.b32.xlu1 %v3776_v24, %s3095_s28  ;;  %2891 = vmatprep.mubr.msk.bf16.mxu1 %vm1376_vm6, %v3340_v51  ;;  %v668_v51 = vsel %vm3266_vm5, %v663_v32, %v667_v19  ;;  %v871_v19 = vrot.slane %v3747_v3, 5 }
  0xd2   : > { %v1596_v18 = vsel %vm1590_vm13, %v1563_v30, %v1314_v7  ;;  %v3849_v27 = vcombine.low %v668_v51, %v678_v41  ;;  %v696_v9 = vor.u32 %v695_v12, %v691_v1  ;;  %v717_v41 = vshrl.u32 %v3892_v61, 16 }
  0xd3   : > { %1224 = vrot.lane.b32.xlu0 %v3708_v47, %s3095_s28  ;;  %v3807_v43 = vpop.permute.xlu1 %1062  ;;  %v873_v53 = vrot.slane %v871_v19, 4 }
  0xd4   : > { %v697_v51 = vrot.slane %v696_v9, 4 }
  0xd5   : > { %v1349_v6 = vpop.permute.xlu0 %1348  ;;  %1261 = vrot.lane.b32.xlu1 %v3798_v10, %s3092_s15  ;;  %v875_v7 = vsel %vm3237_vm4, %v873_v53, %v874_v37 }
  0xd6   : > { %v1629_v17 = vsel %vm1623_vm14, %v1596_v18, %v1349_v6  ;;  %v878_v18 = vrot.slane %v3842_v59, 5  ;;  %v704_v6 = vshrl.u32 %v3883_v26, 16  ;;  %v3921_v59 = vld [vmem:[%s3192_s13 + $0xbc] sm:$0x1] }
  0xd7   : > { %1259 = vrot.lane.b32.xlu0 %v3744_v60, %s3092_s15  ;;  %2857 = vmatprep.mubr.msk.bf16.mxu0 %vm1676_vm15, %v1629_v17  ;;  %v3839_v13 = vpop.permute.xlu1 %1064  ;;  %v680_v60 = vshrl.u32 %v3833_v23, 16 }
  0xd8   : > { %2892 = vmatmul.mubr.msk.bf16.gmra.mrb[4].mxu1 %vm1376_vm6, %v3383_v36  ;;  %v872_v36 = vsel %vm3237_vm4, %v2709_v45, %v871_v19  ;;  %v2710_v19 = vrot.slane %v3833_v23, 9  ;;  %v719_v45 = vrot.slane %v717_v41, 4 }
  0xd9   : > { %v1351_v14 = vpop.permute.xlu0 %1350  ;;  %1296 = vrot.lane.b32.xlu1 %v3823_v35, %s3096_s29  ;;  %2895 = vmatprep.mubr.msk.bf16.mxu1 %vm1376_vm6, %v3421_v55  ;;  %v682_v0 = vrot.slane %v680_v60, 4  ;;  %v699_v55 = vshll.u32 %v330_v63, 16  ;;  %v3889_v11 = vcombine.low %v872_v36, %v875_v7  ;;  %v706_v60 = vrot.slane %v704_v6, 4 }
  0xda   : > { %v1631_v40 = vsel %vm1623_vm14, %v1598_v39, %v1351_v14  ;;  %v881_v14 = vrot.slane %v330_v63, 5 }
  0xdb   : > { %1294 = vrot.lane.b32.xlu0 %v3760_v28, %s3096_s29  ;;  %2858 = vmatmul.mubr.msk.bf16.gmra.mrb[4].mxu0 %vm1676_vm15, %v1631_v40  ;;  %v3859_v3 = vpop.permute.xlu1 %1144  ;;  %v686_v32 = vor.u32 %v685_v2, %v682_v0  ;;  %v701_v44 = vrot.slane %v699_v55, 5  ;;  %v709_v40 = vrot.slane %v707_v50, 5  ;;  %v879_v0 = vsel %vm3237_vm4, %v2710_v19, %v878_v18 }
  0xdc   : > { %v3965_v50 = vcombine.low %v3883_v26, %v3892_v61 }
  0xdd   : > { %v3865_v58 = vpop.permute.xlu0 %1142  ;;  %1331 = vrot.lane.b32.xlu1 %v3849_v27, %s3097_s10  ;;  %v687_v17 = vrot.slane %v686_v32, 4  ;;  %v702_v52 = vsel %vm3266_vm5, %v697_v51, %v701_v44  ;;  %v710_v63 = vor.u32 %v709_v40, %v706_v60  ;;  %v1394_v44 = vsel %vm1376_vm6, %v3401_v46, %v3839_v13 }
  0xde   : > { %v1437_v6 = vsel %vm1425_vm8, %v1394_v44, %v3859_v3  ;;  %v885_v60 = vrot.slane %v3892_v61, 5 }
  0xdf   : > { %1329 = vrot.lane.b32.xlu0 %v3776_v24, %s3097_s10  ;;  %v3874_v20 = vpop.permute.xlu1 %1179  ;;  %v692_v49 = vsel %vm3266_vm5, %v687_v17, %v691_v1  ;;  %v723_v1 = vshll.u32 %v3921_v59, 16  ;;  %v711_v32 = vrot.slane %v710_v63, 4  ;;  %v3968_v17 = vld [vmem:[%s3192_s13 + $0xc4] sm:$0xf] }
  0xe0   : > { %2896 = vmatmul.mubr.msk.bf16.gmra.mrb[8].mxu1 %vm1376_vm6, %v3477_v42  ;;  %v713_v42 = vshll.u32 %v3892_v61, 16  ;;  %v3927_v37 = vcombine.low %v692_v49, %v702_v52  ;;  %v1470_v46 = vsel %vm1458_vm9, %v1437_v6, %v3874_v20  ;;  %v887_v63 = vrot.slane %v885_v60, 4 }
  0xe1   : > { %v1178_v5 = vpop.permute.xlu0 %1177  ;;  %1078 = vrot.lane.b32.xlu1 %v3776_v24, %s3094_s19  ;;  %2899 = vmatprep.mubr.msk.bf16.mxu1 %vm1376_vm6, %v3504_v62  ;;  %v880_v62 = vrot.slane %v878_v18, 4  ;;  %v725_v9 = vrot.slane %v723_v1, 5  ;;  %v3958_v18 = vld [vmem:[%s3192_s13 + $0xc0] sm:$0xf] }
  0xe2   : > { %v715_v15 = vrot.slane %v713_v42, 5  ;;  %v891_v42 = vshrl.u32 %v3958_v18, 16 }
  0xe3   : > { %1364 = vrot.lane.b32.xlu0 %v3798_v10, %s3098_s11  ;;  %v3887_v48 = vpop.permute.xlu1 %1214 }
  0xe4   : > { %v720_v2 = vor.u32 %v719_v45, %v715_v15  ;;  %v716_v3 = vsel %vm3266_vm5, %v711_v32, %v715_v15  ;;  %v1503_v41 = vsel %vm1491_vm10, %v1470_v46, %v3887_v48  ;;  %v904_v48 = vshrl.u32 %v3968_v17, 16 }
  0xe5   : > { %v1213_v30 = vpop.permute.xlu0 %1212  ;;  %1080 = vrot.lane.b32.xlu1 %v3849_v27, %s3094_s19  ;;  %v893_v15 = vrot.slane %v891_v42, 4  ;;  %v2762_v42 = vcombine.low %v3958_v18, %v3968_v17 }
  0xe7   : > { %1366 = vrot.lane.b32.xlu0 %v3889_v11, %s3098_s11  ;;  %v1250_v31 = vpop.permute.xlu1 %1249 }
  0xe8   : > { %2900 = vmatmul.mubr.msk.bf16.gmra.mrb[12].mxu1 %vm1376_vm6, %v3545_v56  ;;  %v1391_v56 = vsel %vm1376_vm6, %v3371_v25, %v3807_v43  ;;  %v721_v43 = vrot.slane %v720_v2, 4  ;;  %v1536_v19 = vsel %vm1524_vm11, %v1503_v41, %v1250_v31 }
  0xe9   : > { %v1248_v39 = vpop.permute.xlu0 %1247  ;;  %1160 = vrot.lane.b32.xlu1 %v3889_v11, %s3093_s16  ;;  %2903 = vmatprep.mubr.msk.bf16.mxu1 %vm1376_vm6, %v3584_v16  ;;  %v1435_v16 = vsel %vm1425_vm8, %v1391_v56, %v3865_v58 }
  0xea   : > { %v1468_v36 = vsel %vm1458_vm9, %v1435_v16, %v1178_v5  ;;  %v726_v20 = vsel %vm3266_vm5, %v721_v43, %v725_v9 }
  0xeb   : > { %1158 = vrot.lane.b32.xlu0 %v3798_v10, %s3093_s16  ;;  %v1285_v23 = vpop.permute.xlu1 %1284  ;;  %v882_v10 = vsel %vm3237_vm4, %v880_v62, %v881_v14  ;;  %v1501_v25 = vsel %vm1491_vm10, %v1468_v36, %v1213_v30  ;;  %v900_v62 = vshll.u32 %v3968_v17, 16  ;;  %v4029_v36 = vld [vmem:[%s3192_s13 + $0xcc] sm:$0xf] }
  0xec   : > { %v3946_v55 = vcombine.low %v879_v0, %v882_v10  ;;  %v1534_v58 = vsel %vm1524_vm11, %v1501_v25, %v1248_v39  ;;  %v1569_v14 = vsel %vm1557_vm12, %v1536_v19, %v1285_v23  ;;  %v906_v23 = vrot.slane %v904_v48, 4  ;;  %v336_v10 = vld [vmem:[%s3192_s13 + $0xc8] sm:$0x1] }
  0xed   : > { %v1283_v53 = vpop.permute.xlu0 %1282  ;;  %1195 = vrot.lane.b32.xlu1 %v3909_v34, %s3091_s14  ;;  %v902_v45 = vrot.slane %v900_v62, 5  ;;  %v888_v0 = vrot.slane %v3921_v59, 5  ;;  %v910_v59 = vshll.u32 %v336_v10, 16  ;;  %v925_v44 = vshrl.u32 %v4029_v36, 16 }
  0xee   : > { %v1567_v30 = vsel %vm1557_vm12, %v1534_v58, %v1283_v53  ;;  %v2711_v53 = vrot.slane %v3883_v26, 9  ;;  %v928_v58 = vshll.u32 %v4029_v36, 16  ;;  %v2712_v62 = vrot.slane %v3958_v18, 9 }
  0xef   : > { %1193 = vrot.lane.b32.xlu0 %v3823_v35, %s3091_s14  ;;  %v1320_v12 = vpop.permute.xlu1 %1319  ;;  %v907_v56 = vor.u32 %v906_v23, %v902_v45  ;;  %v912_v9 = vrot.slane %v910_v59, 5  ;;  %v927_v41 = vrot.slane %v925_v44, 4 }
  0xf0   : > { %2904 = vmatmul.mubr.msk.bf16.gmra.mrb[16].mxu1 %vm1376_vm6, %v3651_v33  ;;  %v1602_v31 = vsel %vm1590_vm13, %v1569_v14, %v1320_v12  ;;  %v886_v12 = vsel %vm3237_vm4, %v2711_v53, %v885_v60  ;;  %v922_v60 = vrot.slane %v336_v10, 5 }
  0xf1   : > { %v1318_v7 = vpop.permute.xlu0 %1317  ;;  %1230 = vrot.lane.b32.xlu1 %v3927_v37, %s3095_s28  ;;  %2907 = vmatprep.mubr.msk.bf16.mxu1 %vm1376_vm6, %v3708_v47  ;;  %v894_v47 = vshll.u32 %v3958_v18, 16  ;;  %v908_v43 = vrot.slane %v907_v56, 4 }
  0xf2   : > { %v1600_v13 = vsel %vm1590_vm13, %v1567_v30, %v1318_v7 }
  0xf3   : > { %1228 = vrot.lane.b32.xlu0 %v3849_v27, %s3095_s28  ;;  %v3955_v5 = vpop.permute.xlu1 %1066  ;;  %v896_v61 = vrot.slane %v894_v47, 5 }
  0xf5   : > { %v1353_v51 = vpop.permute.xlu0 %1352  ;;  %1265 = vrot.lane.b32.xlu1 %v3946_v55, %s3092_s15  ;;  %v897_v1 = vor.u32 %v896_v61, %v893_v15 }
  0xf6   : > { %v1633_v33 = vsel %vm1623_vm14, %v1600_v13, %v1353_v51  ;;  %v919_v13 = vrot.slane %v3968_v17, 5 }
  0xf7   : > { %1263 = vrot.lane.b32.xlu0 %v3889_v11, %s3092_s15  ;;  %2861 = vmatprep.mubr.msk.bf16.mxu0 %vm1676_vm15, %v1633_v33  ;;  %v3991_v39 = vpop.permute.xlu1 %1068  ;;  %v4001_v11 = vcombine.low %v716_v3, %v726_v20  ;;  %v898_v25 = vrot.slane %v897_v1, 4  ;;  %v913_v3 = vsel %vm3266_vm5, %v908_v43, %v912_v9  ;;  %v930_v33 = vrot.slane %v928_v58, 5 }
  0xf8   : > { %2908 = vmatmul.mubr.msk.bf16.gmra.mrb[20].mxu1 %vm1376_vm6, %v3776_v24  ;;  %v889_v24 = vsel %vm3237_vm4, %v887_v63, %v888_v0  ;;  %v921_v14 = vrot.slane %v919_v13, 4 }
  0xf9   : > { %v1355_v40 = vpop.permute.xlu0 %1354  ;;  %1300 = vrot.lane.b32.xlu1 %v3965_v50, %s3096_s29  ;;  %2911 = vmatprep.mubr.msk.bf16.mxu1 %vm1376_vm6, %v3849_v27  ;;  %v4032_v27 = vld [vmem:[%s3192_s13 + $0xd0] sm:$0xf]  ;;  %v4038_v32 = vcombine.low %v886_v12, %v889_v24 }
  0xfa   : > { %v1635_v49 = vsel %vm1623_vm14, %v1602_v31, %v1355_v40  ;;  %v938_v30 = vshrl.u32 %v4032_v27, 16  ;;  %v934_v46 = vshll.u32 %v4032_v27, 16  ;;  %v339_v31 = vld [vmem:[%s3192_s13 + $0xd4] sm:$0x1]  ;;  %v923_v18 = vsel %vm3237_vm4, %v921_v14, %v922_v60  ;;  %s2809_s13 = sshll.u32 %s3186_s9, 8  ;;  %s4422_s9 = sand.u32 1, %s3081_s22  }
  0xfb   : > { %1298 = vrot.lane.b32.xlu0 %v3909_v34, %s3096_s29  ;;  %2862 = vmatmul.mubr.msk.bf16.gmra.mrb[8].mxu0 %vm1676_vm15, %v1635_v49  ;;  %v4007_v52 = vpop.permute.xlu1 %1148  ;;  %v931_v49 = vor.u32 %v930_v33, %v927_v41  ;;  %v944_v61 = vshll.u32 %v339_v31, 16  ;;  %v2765_v43 = vcombine.low %v4029_v36, %v4032_v27 }
  0xfc   : > { %v936_v19 = vrot.slane %v934_v46, 5  ;;  %v940_v47 = vrot.slane %v938_v30, 4  ;;  %v956_v30 = vrot.slane %v339_v31, 5 }
  0xfd   : > { %v1147_v2 = vpop.permute.xlu0 %1146  ;;  %1335 = vrot.lane.b32.xlu1 %v4001_v11, %s3097_s10  ;;  %v932_v63 = vrot.slane %v931_v49, 4  ;;  %v946_v59 = vrot.slane %v944_v61, 5 }
  0xfe   : > { %v941_v17 = vor.u32 %v940_v47, %v936_v19 }
  0xff   : > { %1333 = vrot.lane.b32.xlu0 %v3927_v37, %s3097_s10  ;;  %v4020_v26 = vpop.permute.xlu1 %1183  ;;  %v937_v9 = vsel %vm3266_vm5, %v932_v63, %v936_v19 }
 0x100   : > { %2912 = vmatmul.mubr.msk.bf16.gmra.mrb[24].mxu1 %vm1376_vm6, %v3927_v37  ;;  %v942_v56 = vrot.slane %v941_v17, 4 }
 0x101   : > { %v1182_v16 = vpop.permute.xlu0 %1181  ;;  %1082 = vrot.lane.b32.xlu1 %v3927_v37, %s3094_s19  ;;  %2915 = vmatprep.mubr.msk.bf16.mxu1 %vm1376_vm6, %v4001_v11  ;;  %v903_v37 = vsel %vm3266_vm5, %v898_v25, %v902_v45  ;;  %v920_v45 = vsel %vm3237_vm4, %v2712_v62, %v919_v13 }
 0x102   : > { %v4061_v48 = vcombine.low %v903_v37, %v913_v3  ;;  %v2764_v1 = vcombine.low %v920_v45, %v923_v18 }
 0x103   : > { %1368 = vrot.lane.b32.xlu0 %v3946_v55, %s3098_s11  ;;  %v4036_v7 = vpop.permute.xlu1 %1218 }
 0x105   : > { %v1217_v6 = vpop.permute.xlu0 %1216  ;;  %1084 = vrot.lane.b32.xlu1 %v4001_v11, %s3094_s19 }
 0x107   : > { %1370 = vrot.lane.b32.xlu0 %v4038_v32, %s3098_s11  ;;  %v1254_v51 = vpop.permute.xlu1 %1253 }
 0x108   : > { %2916 = vmatmul.mubr.msk.bf16.gmra.mrb[28].mxu1 %vm1376_vm6, %v4061_v48 }
 0x109   : > { %v1252_v20 = vpop.permute.xlu0 %1251  ;;  %1164 = vrot.lane.b32.xlu1 %v4038_v32, %s3093_s16 }
 0x10b   : > { %1162 = vrot.lane.b32.xlu0 %v3946_v55, %s3093_s16  ;;  %v1289_v40 = vpop.permute.xlu1 %1288  ;;  %v1397_v55 = vsel %vm1376_vm6, %v3464_v29, %v3955_v5  ;;  %v953_v29 = vrot.slane %v4032_v27, 5  ;;  %v1400_v5 = vsel %vm1376_vm6, %v3492_v57, %v3991_v39  ;;  %s4193_s16 = scalar_lea.vmem %s4579_s3, %s2809_s13 }
 0x10c   : > { %v1439_v53 = vsel %vm1425_vm8, %v1397_v55, %v1147_v2 }
 0x10d   : > { %v1287_v15 = vpop.permute.xlu0 %1286  ;;  %1199 = vrot.lane.b32.xlu1 %v2762_v42, %s3091_s14  ;;  %v1472_v0 = vsel %vm1458_vm9, %v1439_v53, %v1182_v16  ;;  %v1441_v16 = vsel %vm1425_vm8, %v1400_v5, %v4007_v52  ;;  %v2713_v52 = vrot.slane %v4029_v36, 9 }
 0x10e   : > { %v1505_v12 = vsel %vm1491_vm10, %v1472_v0, %v1217_v6  ;;  %v1474_v57 = vsel %vm1458_vm9, %v1441_v16, %v4020_v26  ;;  %v955_v6 = vrot.slane %v953_v29, 4 }
 0x10f   : > { %1197 = vrot.lane.b32.xlu0 %v3965_v50, %s3091_s14  ;;  %v1324_v23 = vpop.permute.xlu1 %1323  ;;  %v1538_v2 = vsel %vm1524_vm11, %v1505_v12, %v1252_v20  ;;  %v1507_v58 = vsel %vm1491_vm10, %v1474_v57, %v4036_v7  ;;  %v954_v3 = vsel %vm3237_vm4, %v2713_v52, %v953_v29 }
 0x110   : > { %v1571_v25 = vsel %vm1557_vm12, %v1538_v2, %v1287_v15  ;;  %v1540_v46 = vsel %vm1524_vm11, %v1507_v58, %v1254_v51  ;;  %v957_v51 = vsel %vm3237_vm4, %v955_v6, %v956_v30 }
 0x111   : > { %v1322_v10 = vpop.permute.xlu0 %1321  ;;  %1234 = vrot.lane.b32.xlu1 %v4061_v48, %s3095_s28  ;;  %v1573_v54 = vsel %vm1557_vm12, %v1540_v46, %v1289_v40  ;;  %v2767_v33 = vcombine.low %v954_v3, %v957_v51 }
 0x112   : > { %v1604_v39 = vsel %vm1590_vm13, %v1571_v25, %v1322_v10  ;;  %v1606_v13 = vsel %vm1590_vm13, %v1573_v54, %v1324_v23 }
 0x113   : > { %1232 = vrot.lane.b32.xlu0 %v4001_v11, %s3095_s28  ;;  %v1071_v24 = vpop.permute.xlu1 %1070  ;;  %v947_v11 = vsel %vm3266_vm5, %v942_v56, %v946_v59  ;;  %s4236_s28 = scalar_lea.vmem %s4581_s5, %s2809_s13  ;;  %s2512_s13 = scalar_lea.sflag [#allocation5], %s4422_s9 }
 0x114   : > { %v2766_v7 = vcombine.low %v937_v9, %v947_v11  ;;  %v1403_v31 = vsel %vm1376_vm6, %v3534_v38, %v1071_v24 }
 0x115   : > { %v1357_v44 = vpop.permute.xlu0 %1356  ;;  %1269 = vrot.lane.b32.xlu1 %v2764_v1, %s3092_s15 }
 0x116   : > { %v1637_v27 = vsel %vm1623_vm14, %v1604_v39, %v1357_v44 }
 0x117   : > { %1267 = vrot.lane.b32.xlu0 %v4038_v32, %s3092_s15  ;;  %2865 = vmatprep.mubr.msk.bf16.mxu0 %vm1676_vm15, %v1637_v27  ;;  %v1073_v26 = vpop.permute.xlu1 %1072  ;;  %s3099_s15 = smov [#allocation4]  }
 0x118   : > { %v1406_v61 = vsel %vm1376_vm6, %v3567_v4, %v1073_v26  ;;  %s2999_s19 = sshll.u32 %s3099_s15, 4  ;;  %s3000_s19 = int_to_ptr.vmem [resolvable:$false] %s2999_s19 }
 0x119   : > { %v1359_v36 = vpop.permute.xlu0 %1358  ;;  %1304 = vrot.lane.b32.xlu1 %v2765_v43, %s3096_s29  ;;  %s3001_s26 = scalar_lea.vmem %s3000_s19, 64 }
 0x11a   : > { %v1639_v37 = vsel %vm1623_vm14, %v1606_v13, %v1359_v36 }
 0x11b   : > { %1302 = vrot.lane.b32.xlu0 %v2762_v42, %s3096_s29  ;;  %2866 = vmatmul.mubr.msk.bf16.gmra.mrb[12].mxu0 %vm1676_vm15, %v1639_v37  ;;  %v1153_v32 = vpop.permute.xlu1 %1152  ;;  %s2689_s29 = sshll.u32 %s4422_s9, 1 }
 0x11c   : > { %v1445_v55 = vsel %vm1425_vm8, %v1406_v61, %v1153_v32 }
 0x11d   : > { %v1151_v41 = vpop.permute.xlu0 %1150  ;;  %1339 = vrot.lane.b32.xlu1 %v2766_v7, %s3097_s10 }
 0x11e   : > { %v1443_v49 = vsel %vm1425_vm8, %v1403_v31, %v1151_v41 }
 0x11f   : > { %1337 = vrot.lane.b32.xlu0 %v4061_v48, %s3097_s10  ;;  %v1188_v20 = vpop.permute.xlu1 %1187  ;;  %s269_s10 = scalar_lea.vmem [#allocation4], %s2689_s29 }
 0x120   : > { %v1478_v38 = vsel %vm1458_vm9, %v1445_v55, %v1188_v20  ;;  %s2544_s20 = sshll.u32 %s269_s10, 4  ;;  %s2545_s20 = int_to_ptr.vmem [resolvable:$true] %s2544_s20 }
 0x121   : > { %v1186_v19 = vpop.permute.xlu0 %1185  ;;  %1374 = vrot.lane.b32.xlu1 %v2767_v33, %s3098_s11  ;;  %s2995_s14 = scalar_lea.vmem %s2545_s20, 32  ;;  %p3002_p0 = scmp.lt.s32.totalorder %s2545_s20, %s3000_s19 }
 0x122   : > { %v1476_v48 = vsel %vm1458_vm9, %v1443_v49, %v1186_v19  ;;  %p2996_p11 = scmp.ne.s32.totalorder %s2545_s20, %s2995_s14  ;;  %p3003_p1 = scmp.lt.s32.totalorder %s3001_s26, %s2995_s14 }
 0x123   : > { %1372 = vrot.lane.b32.xlu0 %v2764_v1, %s3098_s11  ;;  %v1223_v21 = vpop.permute.xlu1 %1222  ;;  %s2805_s11 = sshll.u32 %s3157_s25, 5 }
 0x124   : > { %v1511_v0 = vsel %vm1491_vm10, %v1478_v38, %v1223_v21  ;;  %s4440_s18 = scalar_lea.hbm %s4582_s6, %s2805_s11  ;;  %p2997_p12 = pnand %p2996_p11, %p3174_p5 }
 0x125   : > { %v1221_v47 = vpop.permute.xlu0 %1220  ;;  %p3004_p2 = por %p3003_p1, %p3002_p0 }
 0x126   : > { %v1509_v17 = vsel %vm1491_vm10, %v1476_v48, %v1221_v47  ;;  %p2998_p13 = pneg %p2997_p12 }
 0x127   : > { %v1258_v62 = vpop.permute.xlu1 %1257 }
 0x128   : > { %v1544_v1 = vsel %vm1524_vm11, %v1511_v0, %v1258_v62  ;;  %p3005_p3 = pnand %p3004_p2, %p2998_p13 }
 0x129   : > { %v1256_v42 = vpop.permute.xlu0 %1255 }
 0x12a   : > { %v1542_v45 = vsel %vm1524_vm11, %v1509_v17, %v1256_v42 }
 0x12b   : > { %v1293_v14 = vpop.permute.xlu1 %1292 }
 0x12c   : > { %v1577_v56 = vsel %vm1557_vm12, %v1544_v1, %v1293_v14 }
 0x12d   : > { %v1291_v60 = vpop.permute.xlu0 %1290 }
 0x12e   : > { %v1575_v23 = vsel %vm1557_vm12, %v1542_v45, %v1291_v60 }
 0x12f   : > { %v1328_v40 = vpop.permute.xlu1 %1327 }
 0x130   : > { %v1610_v59 = vsel %vm1590_vm13, %v1577_v56, %v1328_v40 }
 0x131   : > { %v1326_v15 = vpop.permute.xlu0 %1325 }
 0x132   : > { %v1608_v53 = vsel %vm1590_vm13, %v1575_v23, %v1326_v15 }
 0x133   : > { %v1075_v18 = vpop.permute.xlu1 %1074 }
 0x134   : > { %v1409_v11 = vsel %vm1376_vm6, %v3628_v8, %v1075_v18 }
 0x135   : > { %v1361_v63 = vpop.permute.xlu0 %1360 }
 0x136   : > { %v1641_v10 = vsel %vm1623_vm14, %v1608_v53, %v1361_v63 }
 0x137   : > { %2869 = vmatprep.mubr.msk.bf16.mxu0 %vm1676_vm15, %v1641_v10  ;;  %v1077_v4 = vpop.permute.xlu1 %1076 }
 0x138   : > { %v1412_v46 = vsel %vm1376_vm6, %v3683_v22, %v1077_v4 }
 0x139   : > { %v1363_v12 = vpop.permute.xlu0 %1362 }
 0x13a   : > { %v1643_v29 = vsel %vm1623_vm14, %v1610_v59, %v1363_v12 }
 0x13b   : > { %2870 = vmatmul.mubr.msk.bf16.gmra.mrb[16].mxu0 %vm1676_vm15, %v1643_v29  ;;  %v1157_v5 = vpop.permute.xlu1 %1156 }
 0x13c   : > { %v1449_v13 = vsel %vm1425_vm8, %v1412_v46, %v1157_v5 }
 0x13d   : > { %v1155_v2 = vpop.permute.xlu0 %1154 }
 0x13e   : > { %v1447_v58 = vsel %vm1425_vm8, %v1409_v11, %v1155_v2 }
 0x13f   : > { %v1192_v24 = vpop.permute.xlu1 %1191 }
 0x140   : > { %v1482_v8 = vsel %vm1458_vm9, %v1449_v13, %v1192_v24 }
 0x141   : > { %v1190_v16 = vpop.permute.xlu0 %1189 }
 0x142   : > { %v1480_v27 = vsel %vm1458_vm9, %v1447_v58, %v1190_v16 }
 0x143   : > { %v1227_v25 = vpop.permute.xlu1 %1226 }
 0x144   : > { %v1515_v3 = vsel %vm1491_vm10, %v1482_v8, %v1227_v25 }
 0x145   : > { %v1225_v43 = vpop.permute.xlu0 %1224 }
 0x146   : > { %v1513_v30 = vsel %vm1491_vm10, %v1480_v27, %v1225_v43 }
 0x147   : > { %v1262_v9 = vpop.permute.xlu1 %1261 }
 0x148   : > { %v1548_v32 = vsel %vm1524_vm11, %v1515_v3, %v1262_v9 }
 0x149   : > { %v1260_v57 = vpop.permute.xlu0 %1259 }
 0x14a   : > { %v1546_v26 = vsel %vm1524_vm11, %v1513_v30, %v1260_v57 }
 0x14b   : > { %v1297_v39 = vpop.permute.xlu1 %1296 }
 0x14c   : > { %v1581_v41 = vsel %vm1557_vm12, %v1548_v32, %v1297_v39 }
 0x14d   : > { %v1295_v44 = vpop.permute.xlu0 %1294 }
 0x14e   : > { %v1579_v36 = vsel %vm1557_vm12, %v1546_v26, %v1295_v44 }
 0x14f   : > { %v1332_v52 = vpop.permute.xlu1 %1331 }
 0x150   : > { %v1614_v33 = vsel %vm1590_vm13, %v1581_v41, %v1332_v52 }
 0x151   : > { %v1330_v6 = vpop.permute.xlu0 %1329 }
 0x152   : > { %v1612_v7 = vsel %vm1590_vm13, %v1579_v36, %v1330_v6 }
 0x153   : > { %v1079_v54 = vpop.permute.xlu1 %1078 }
 0x154   : > { %v1415_v15 = vsel %vm1376_vm6, %v3760_v28, %v1079_v54 }
 0x155   : > { %v1365_v37 = vpop.permute.xlu0 %1364 }
 0x156   : > { %v1645_v51 = vsel %vm1623_vm14, %v1612_v7, %v1365_v37 }
 0x157   : > { %2873 = vmatprep.mubr.msk.bf16.mxu0 %vm1676_vm15, %v1645_v51  ;;  %v1081_v22 = vpop.permute.xlu1 %1080 }
 0x158   : > { %v1418_v23 = vsel %vm1376_vm6, %v3823_v35, %v1081_v22 }
 0x159   : > { %v1367_v20 = vpop.permute.xlu0 %1366 }
 0x15a   : > { %v1647_v19 = vsel %vm1623_vm14, %v1614_v33, %v1367_v20 }
 0x15b   : > { %2874 = vmatmul.mubr.msk.bf16.gmra.mrb[20].mxu0 %vm1676_vm15, %v1647_v19  ;;  %v1161_v21 = vpop.permute.xlu1 %1160 }
 0x15c   : > { %v1453_v63 = vsel %vm1425_vm8, %v1418_v23, %v1161_v21 }
 0x15d   : > { %v1159_v47 = vpop.permute.xlu0 %1158 }
 0x15e   : > { %v1451_v61 = vsel %vm1425_vm8, %v1415_v15, %v1159_v47 }
 0x15f   : > { %v1196_v62 = vpop.permute.xlu1 %1195 }
 0x160   : > { %v1486_v28 = vsel %vm1458_vm9, %v1453_v63, %v1196_v62 }
 0x161   : > { %v1194_v42 = vpop.permute.xlu0 %1193 }
 0x162   : > { %v1484_v45 = vsel %vm1458_vm9, %v1451_v61, %v1194_v42 }
 0x163   : > { %v1231_v14 = vpop.permute.xlu1 %1230 }
 0x164   : > { %v1519_v4 = vsel %vm1491_vm10, %v1486_v28, %v1231_v14 }
 0x165   : > { %v1229_v60 = vpop.permute.xlu0 %1228 }
 0x166   : > { %v1517_v55 = vsel %vm1491_vm10, %v1484_v45, %v1229_v60 }
 0x167   : > { %v1266_v31 = vpop.permute.xlu1 %1265 }
 0x168   : > { %v1552_v59 = vsel %vm1524_vm11, %v1519_v4, %v1266_v31 }
 0x169   : > { %v1264_v40 = vpop.permute.xlu0 %1263 }
 0x16a   : > { %v1550_v38 = vsel %vm1524_vm11, %v1517_v55, %v1264_v40 }
 0x16b   : > { %v1301_v49 = vpop.permute.xlu1 %1300 }
 0x16c   : > { %v1585_v12 = vsel %vm1557_vm12, %v1552_v59, %v1301_v49 }
 0x16d   : > { %v1299_v48 = vpop.permute.xlu0 %1298 }
 0x16e   : > { %v1583_v0 = vsel %vm1557_vm12, %v1550_v38, %v1299_v48 }
 0x16f   : > { %v1336_v17 = vpop.permute.xlu1 %1335 }
 0x170   : > { %v1618_v29 = vsel %vm1590_vm13, %v1585_v12, %v1336_v17 }
 0x171   : > { %v1334_v18 = vpop.permute.xlu0 %1333 }
 0x172   : > { %v1616_v10 = vsel %vm1590_vm13, %v1583_v0, %v1334_v18 }
 0x173   : > { %v1083_v53 = vpop.permute.xlu1 %1082 }
 0x174   : > { %v1421_v52 = vsel %vm1376_vm6, %v3909_v34, %v1083_v53 }
 0x175   : > { %v1369_v1 = vpop.permute.xlu0 %1368 }
 0x176   : > { %v1649_v56 = vsel %vm1623_vm14, %v1616_v10, %v1369_v1 }
 0x177   : > { %2877 = vmatprep.mubr.msk.bf16.mxu0 %vm1676_vm15, %v1649_v56  ;;  %v1085_v35 = vpop.permute.xlu1 %1084 }
 0x178   : > { %v1424_v58 = vsel %vm1376_vm6, %v3965_v50, %v1085_v35 }
 0x179   : > { %v1371_v5 = vpop.permute.xlu0 %1370 }
 0x17a   : > { %v1651_v2 = vsel %vm1623_vm14, %v1618_v29, %v1371_v5 }
 0x17b   : > { %2878 = vmatmul.mubr.msk.bf16.gmra.mrb[24].mxu0 %vm1676_vm15, %v1651_v2  ;;  %v1165_v24 = vpop.permute.xlu1 %1164 }
 0x17c   : > { %v1457_v6 = vsel %vm1425_vm8, %v1424_v58, %v1165_v24 }
 0x17d   : > { %v1163_v16 = vpop.permute.xlu0 %1162 }
 0x17e   : > { %v1455_v30 = vsel %vm1425_vm8, %v1421_v52, %v1163_v16 }
 0x17f   : > { %v1200_v25 = vpop.permute.xlu1 %1199 }
 0x180   : > { %v1490_v26 = vsel %vm1458_vm9, %v1457_v6, %v1200_v25 }
 0x181   : > { %v1198_v43 = vpop.permute.xlu0 %1197 }
 0x182   : > { %v1488_v54 = vsel %vm1458_vm9, %v1455_v30, %v1198_v43 }
 0x183   : > { %v1235_v9 = vpop.permute.xlu1 %1234 }
 0x184   : > { %v1523_v34 = vsel %vm1491_vm10, %v1490_v26, %v1235_v9 }
 0x185   : > { %v1233_v57 = vpop.permute.xlu0 %1232 }
 0x186   : > { %v1521_v50 = vsel %vm1491_vm10, %v1488_v54, %v1233_v57 }
 0x187   : > { %v1270_v39 = vpop.permute.xlu1 %1269 }
 0x188   : > { %v1556_v37 = vsel %vm1524_vm11, %v1523_v34, %v1270_v39 }
 0x189   : > { %v1268_v44 = vpop.permute.xlu0 %1267 }
 0x18a   : > { %v1554_v3 = vsel %vm1524_vm11, %v1521_v50, %v1268_v44 }
 0x18b   : > { %v1305_v11 = vpop.permute.xlu1 %1304 }
 0x18c   : > { %v1589_v19 = vsel %vm1557_vm12, %v1556_v37, %v1305_v11 }
 0x18d   : > { %v1303_v27 = vpop.permute.xlu0 %1302 }
 0x18e   : > { %v2855_v46 = vpop.f32.mrb[0].mxu0  ;;  %v1587_v21 = vsel %vm1557_vm12, %v1554_v3, %v1303_v27 }
 0x18f   : > { %1876 = vst.msk [vmem:[%s4193_s16 + $0x10] sm:$0xff] %vm1425_vm8, %v2855_v46  ;;  %v1747_v13 = vpop.f32.mrb[1].mxu0  ;;  %v1340_v36 = vpop.permute.xlu1 %1339  ;;  %v1979_v22 = vmul.f32 %v2855_v46, %v2855_v46  ;;  %v1909_v47 = vsel %vm1425_vm8, %v2855_v46, 0.0 }
 0x190   : > { %1874 = vst.msk [vmem:[%s4193_s16] sm:$0xff] %vm1425_vm8, %v1747_v13  ;;  %v1977_v8 = vmul.f32 %v1747_v13, %v1747_v13  ;;  %v2856_v7 = vpop.f32.mrb[2].mxu0  ;;  %v1906_v41 = vsel %vm1425_vm8, %v1747_v13, 0.0  ;;  %v1622_v31 = vsel %vm1590_vm13, %v1589_v19, %v1340_v36 }
 0x191   : > { %1877 = vst.msk [vmem:[%s4193_s16 + $0x18] sm:$0xff] %vm1425_vm8, %v2856_v7  ;;  %v1750_v51 = vpop.f32.mrb[3].mxu0  ;;  %v1338_v32 = vpop.permute.xlu0 %1337  ;;  %v1980_v60 = vmul.f32 %v2856_v7, %v2856_v7  ;;  %v2012_v45 = vsel %vm1425_vm8, %v1979_v22, 0.0  ;;  %v1911_v18 = vsel %vm1425_vm8, %v2856_v7, 0.0 }
 0x192   : > { %1875 = vst.msk [vmem:[%s4193_s16 + $0x8] sm:$0xff] %vm1425_vm8, %v1750_v51  ;;  %v1907_v33 = vsel %vm1425_vm8, %v1750_v51, 0.0  ;;  %v1978_v20 = vmul.f32 %v1750_v51, %v1750_v51  ;;  %v2009_v14 = vsel %vm1425_vm8, %v1977_v8, 0.0  ;;  %v1620_v15 = vsel %vm1590_vm13, %v1587_v21, %v1338_v32 }
 0x193   : > { %v1908_v62 = vadd.f32 %v1907_v33, %v1906_v41  ;;  %v1375_v42 = vpop.permute.xlu1 %1374  ;;  %v2014_v53 = vsel %vm1425_vm8, %v1980_v60, 0.0 }
 0x194   : > { %v2010_v40 = vsel %vm1425_vm8, %v1978_v20, 0.0  ;;  %v1655_v17 = vsel %vm1623_vm14, %v1622_v31, %v1375_v42 }
 0x195   : > { %v1910_v49 = vadd.f32 %v1909_v47, %v1908_v62  ;;  %v2011_v48 = vadd.f32 %v2010_v40, %v2009_v14  ;;  %v1373_v61 = vpop.permute.xlu0 %1372 }
 0x196   : > { %v1653_v55 = vsel %vm1623_vm14, %v1620_v15, %v1373_v61 }
 0x197   : > { %v2013_v23 = vadd.f32 %v2012_v45, %v2011_v48  ;;  %2881 = vmatprep.mubr.msk.bf16.mxu0 %vm1676_vm15, %v1653_v55  ;;  %v1912_v38 = vadd.f32 %v1911_v18, %v1910_v49 }
 0x198   : > { %2882 = vmatmul.mubr.msk.bf16.gmra.mrb[28].mxu0 %vm1676_vm15, %v1655_v17 }
 0x199   : > { %v2015_v63 = vadd.f32 %v2014_v53, %v2013_v23 }
 0x1a3   : > { %v2889_v0 = vpop.f32.mrb[0].mxu1 }
 0x1a4   : > { %2294 = vst.msk [vmem:[%s4236_s28 + $0x10] sm:$0xff] %vm1425_vm8, %v2889_v0  ;;  %v2165_v28 = vpop.f32.mrb[1].mxu1  ;;  %v2396_v10 = vmul.f32 %v2889_v0, %v2889_v0  ;;  %v2327_v35 = vsel %vm1425_vm8, %v2889_v0, 0.0 }
 0x1a5   : > { %2292 = vst.msk [vmem:[%s4236_s28] sm:$0xff] %vm1425_vm8, %v2165_v28  ;;  %v2324_v1 = vsel %vm1425_vm8, %v2165_v28, 0.0  ;;  %v2394_v4 = vmul.f32 %v2165_v28, %v2165_v28  ;;  %v2890_v56 = vpop.f32.mrb[2].mxu1 }
 0x1a6   : > { %2295 = vst.msk [vmem:[%s4236_s28 + $0x18] sm:$0xff] %vm1425_vm8, %v2890_v56  ;;  %v2168_v59 = vpop.f32.mrb[3].mxu1  ;;  %v2429_v24 = vsel %vm1425_vm8, %v2396_v10, 0.0  ;;  %v2329_v16 = vsel %vm1425_vm8, %v2890_v56, 0.0  ;;  %v2397_v43 = vmul.f32 %v2890_v56, %v2890_v56 }
 0x1a7   : > { %v2426_v12 = vsel %vm1425_vm8, %v2394_v4, 0.0  ;;  %2293 = vst.msk [vmem:[%s4236_s28 + $0x8] sm:$0xff] %vm1425_vm8, %v2168_v59  ;;  %v2325_v29 = vsel %vm1425_vm8, %v2168_v59, 0.0  ;;  %v2395_v5 = vmul.f32 %v2168_v59, %v2168_v59 }
 0x1a8   : > { %v2326_v2 = vadd.f32 %v2325_v29, %v2324_v1  ;;  %v2431_v36 = vsel %vm1425_vm8, %v2397_v43, 0.0 }
 0x1a9   : > { %v2427_v25 = vsel %vm1425_vm8, %v2395_v5, 0.0 }
 0x1aa   : > { %v2328_v9 = vadd.f32 %v2327_v35, %v2326_v2  ;;  %v2428_v57 = vadd.f32 %v2427_v25, %v2426_v12 }
 0x1ab   : > { %v2893_v58 = vpop.f32.mrb[4].mxu1 }
 0x1ac   : > { %v2430_v52 = vadd.f32 %v2429_v24, %v2428_v57  ;;  %v2330_v27 = vadd.f32 %v2329_v16, %v2328_v9  ;;  %2298 = vst.msk [vmem:[%s4236_s28 + $0x30] sm:$0xff] %vm1425_vm8, %v2893_v58  ;;  %v2181_v26 = vpop.f32.mrb[5].mxu1  ;;  %v2335_v60 = vsel %vm1425_vm8, %v2893_v58, 0.0  ;;  %v2400_v31 = vmul.f32 %v2893_v58, %v2893_v58 }
 0x1ad   : > { %2296 = vst.msk [vmem:[%s4236_s28 + $0x20] sm:$0xff] %vm1425_vm8, %v2181_v26  ;;  %v2894_v34 = vpop.f32.mrb[6].mxu1  ;;  %v2331_v20 = vsel %vm1425_vm8, %v2181_v26, 0.0  ;;  %v2398_v19 = vmul.f32 %v2181_v26, %v2181_v26 }
 0x1ae   : > { %v2859_v39 = vpop.f32.mrb[4].mxu0  ;;  %2299 = vst.msk [vmem:[%s4236_s28 + $0x38] sm:$0xff] %vm1425_vm8, %v2894_v34  ;;  %v2184_v3 = vpop.f32.mrb[7].mxu1  ;;  %v2432_v21 = vadd.f32 %v2431_v36, %v2430_v52  ;;  %v2332_v14 = vadd.f32 %v2331_v20, %v2330_v27  ;;  %v2337_v55 = vsel %vm1425_vm8, %v2894_v34, 0.0  ;;  %v2401_v23 = vmul.f32 %v2894_v34, %v2894_v34 }
 0x1af   : > { %1880 = vst.msk [vmem:[%s4193_s16 + $0x30] sm:$0xff] %vm1425_vm8, %v2859_v39  ;;  %v1983_v44 = vmul.f32 %v2859_v39, %v2859_v39  ;;  %v1763_v11 = vpop.f32.mrb[5].mxu0  ;;  %v1917_v50 = vsel %vm1425_vm8, %v2859_v39, 0.0  ;;  %2297 = vst.msk [vmem:[%s4236_s28 + $0x28] sm:$0xff] %vm1425_vm8, %v2184_v3  ;;  %v2433_v40 = vsel %vm1425_vm8, %v2398_v19, 0.0  ;;  %v2333_v49 = vsel %vm1425_vm8, %v2184_v3, 0.0 }
 0x1b0   : > { %1878 = vst.msk [vmem:[%s4193_s16 + $0x20] sm:$0xff] %vm1425_vm8, %v1763_v11  ;;  %v1913_v6 = vsel %vm1425_vm8, %v1763_v11, 0.0  ;;  %v1981_v30 = vmul.f32 %v1763_v11, %v1763_v11  ;;  %v2860_v46 = vpop.f32.mrb[6].mxu0  ;;  %v2434_v17 = vadd.f32 %v2433_v40, %v2432_v21  ;;  %v2334_v61 = vadd.f32 %v2333_v49, %v2332_v14 }
 0x1b1   : > { %v1914_v54 = vadd.f32 %v1913_v6, %v1912_v38  ;;  %1881 = vst.msk [vmem:[%s4193_s16 + $0x38] sm:$0xff] %vm1425_vm8, %v2860_v46  ;;  %v1766_v13 = vpop.f32.mrb[7].mxu0  ;;  %v2020_v51 = vsel %vm1425_vm8, %v1983_v44, 0.0  ;;  %v1984_v22 = vmul.f32 %v2860_v46, %v2860_v46  ;;  %v1919_v47 = vsel %vm1425_vm8, %v2860_v46, 0.0 }
 0x1b2   : > { %v2016_v8 = vsel %vm1425_vm8, %v1981_v30, 0.0  ;;  %1879 = vst.msk [vmem:[%s4193_s16 + $0x28] sm:$0xff] %vm1425_vm8, %v1766_v13  ;;  %v1915_v7 = vsel %vm1425_vm8, %v1766_v13, 0.0  ;;  %v1982_v37 = vmul.f32 %v1766_v13, %v1766_v13  ;;  %v2399_v38 = vmul.f32 %v2184_v3, %v2184_v3 }
 0x1b3   : > { %v2017_v32 = vadd.f32 %v2016_v8, %v2015_v63  ;;  %v1916_v41 = vadd.f32 %v1915_v7, %v1914_v54  ;;  %v2897_v45 = vpop.f32.mrb[8].mxu1  ;;  %v2022_v18 = vsel %vm1425_vm8, %v1984_v22, 0.0  ;;  %v2336_v0 = vadd.f32 %v2335_v60, %v2334_v61 }
 0x1b4   : > { %v2018_v33 = vsel %vm1425_vm8, %v1982_v37, 0.0  ;;  %2302 = vst.msk [vmem:[%s4236_s28 + $0x50] sm:$0xff] %vm1425_vm8, %v2897_v45  ;;  %v2197_v53 = vpop.f32.mrb[9].mxu1  ;;  %v2437_v10 = vsel %vm1425_vm8, %v2400_v31, 0.0  ;;  %v2435_v1 = vsel %vm1425_vm8, %v2399_v38, 0.0  ;;  %v2439_v29 = vsel %vm1425_vm8, %v2401_v23, 0.0 }
 0x1b5   : > { %v1918_v62 = vadd.f32 %v1917_v50, %v1916_v41  ;;  %v2019_v42 = vadd.f32 %v2018_v33, %v2017_v32  ;;  %2300 = vst.msk [vmem:[%s4236_s28 + $0x40] sm:$0xff] %vm1425_vm8, %v2197_v53  ;;  %v2898_v28 = vpop.f32.mrb[10].mxu1  ;;  %v2339_v4 = vsel %vm1425_vm8, %v2197_v53, 0.0  ;;  %v2402_v56 = vmul.f32 %v2197_v53, %v2197_v53 }
 0x1b6   : > { %2303 = vst.msk [vmem:[%s4236_s28 + $0x58] sm:$0xff] %vm1425_vm8, %v2898_v28  ;;  %v2200_v59 = vpop.f32.mrb[11].mxu1  ;;  %v2436_v35 = vadd.f32 %v2435_v1, %v2434_v17  ;;  %v2338_v12 = vadd.f32 %v2337_v55, %v2336_v0  ;;  %v2343_v25 = vsel %vm1425_vm8, %v2897_v45, 0.0  ;;  %v2404_v43 = vmul.f32 %v2897_v45, %v2897_v45 }
 0x1b7   : > { %v2021_v48 = vadd.f32 %v2020_v51, %v2019_v42  ;;  %v4281_v15 = vadd.f32 %v1919_v47, %v1918_v62  ;;  %2301 = vst.msk [vmem:[%s4236_s28 + $0x48] sm:$0xff] %vm1425_vm8, %v2200_v59  ;;  %v2341_v5 = vsel %vm1425_vm8, %v2200_v59, 0.0  ;;  %v2403_v2 = vmul.f32 %v2200_v59, %v2200_v59 }
 0x1b8   : > { %v2438_v24 = vadd.f32 %v2437_v10, %v2436_v35  ;;  %v2340_v16 = vadd.f32 %v2339_v4, %v2338_v12  ;;  %v2441_v9 = vsel %vm1425_vm8, %v2402_v56, 0.0  ;;  %v2345_v11 = vsel %vm1425_vm8, %v2898_v28, 0.0 }
 0x1b9   : > { %v4287_v63 = vadd.f32 %v2022_v18, %v2021_v48  ;;  %v2405_v52 = vmul.f32 %v2898_v28, %v2898_v28  ;;  %v2443_v58 = vsel %vm1425_vm8, %v2403_v2, 0.0  ;;  %v2445_v26 = vsel %vm1425_vm8, %v2404_v43, 0.0 }
 0x1ba   : > { %v2440_v57 = vadd.f32 %v2439_v29, %v2438_v24  ;;  %v2342_v39 = vadd.f32 %v2341_v5, %v2340_v16 }
 0x1bb   : > { %v2901_v44 = vpop.f32.mrb[12].mxu1  ;;  %v2447_v8 = vsel %vm1425_vm8, %v2405_v52, 0.0 }
 0x1bc   : > { %2306 = vst.msk [vmem:[%s4236_s28 + $0x70] sm:$0xff] %vm1425_vm8, %v2901_v44  ;;  %v2213_v27 = vpop.f32.mrb[13].mxu1  ;;  %v2442_v6 = vadd.f32 %v2441_v9, %v2440_v57  ;;  %v2344_v30 = vadd.f32 %v2343_v25, %v2342_v39  ;;  %v2351_v32 = vsel %vm1425_vm8, %v2901_v44, 0.0  ;;  %v2408_v22 = vmul.f32 %v2901_v44, %v2901_v44 }
 0x1bd   : > { %2304 = vst.msk [vmem:[%s4236_s28 + $0x60] sm:$0xff] %vm1425_vm8, %v2213_v27  ;;  %v2902_v46 = vpop.f32.mrb[14].mxu1  ;;  %v2347_v54 = vsel %vm1425_vm8, %v2213_v27, 0.0  ;;  %v2406_v13 = vmul.f32 %v2213_v27, %v2213_v27 }
 0x1be   : > { %2307 = vst.msk [vmem:[%s4236_s28 + $0x78] sm:$0xff] %vm1425_vm8, %v2902_v46  ;;  %v2216_v36 = vpop.f32.mrb[15].mxu1  ;;  %v2444_v34 = vadd.f32 %v2443_v58, %v2442_v6  ;;  %v2346_v50 = vadd.f32 %v2345_v11, %v2344_v30  ;;  %v2353_v21 = vsel %vm1425_vm8, %v2902_v46, 0.0  ;;  %v2409_v47 = vmul.f32 %v2902_v46, %v2902_v46 }
 0x1bf   : > { %2305 = vst.msk [vmem:[%s4236_s28 + $0x68] sm:$0xff] %vm1425_vm8, %v2216_v36  ;;  %v2349_v7 = vsel %vm1425_vm8, %v2216_v36, 0.0  ;;  %v2407_v37 = vmul.f32 %v2216_v36, %v2216_v36  ;;  %v2449_v41 = vsel %vm1425_vm8, %v2406_v13, 0.0  ;;  %v2453_v40 = vsel %vm1425_vm8, %v2408_v22, 0.0 }
 0x1c0   : > { %v2446_v3 = vadd.f32 %v2445_v26, %v2444_v34  ;;  %v2348_v51 = vadd.f32 %v2347_v54, %v2346_v50  ;;  %v2455_v55 = vsel %vm1425_vm8, %v2409_v47, 0.0 }
 0x1c1   : > { %v2451_v62 = vsel %vm1425_vm8, %v2407_v37, 0.0 }
 0x1c2   : > { %v2448_v33 = vadd.f32 %v2447_v8, %v2446_v3  ;;  %v2350_v20 = vadd.f32 %v2349_v7, %v2348_v51 }
 0x1c3   : > { %v2905_v19 = vpop.f32.mrb[16].mxu1 }
 0x1c4   : > { %2310 = vst.msk [vmem:[%s4236_s28 + $0x90] sm:$0xff] %vm1425_vm8, %v2905_v19  ;;  %v2229_v42 = vpop.f32.mrb[17].mxu1  ;;  %v2450_v14 = vadd.f32 %v2449_v41, %v2448_v33  ;;  %v2352_v60 = vadd.f32 %v2351_v32, %v2350_v20  ;;  %v2412_v61 = vmul.f32 %v2905_v19, %v2905_v19  ;;  %v2359_v1 = vsel %vm1425_vm8, %v2905_v19, 0.0 }
 0x1c5   : > { %2308 = vst.msk [vmem:[%s4236_s28 + $0x80] sm:$0xff] %vm1425_vm8, %v2229_v42  ;;  %v2906_v31 = vpop.f32.mrb[18].mxu1  ;;  %v2355_v49 = vsel %vm1425_vm8, %v2229_v42, 0.0  ;;  %v2410_v18 = vmul.f32 %v2229_v42, %v2229_v42 }
 0x1c6   : > { %2311 = vst.msk [vmem:[%s4236_s28 + $0x98] sm:$0xff] %vm1425_vm8, %v2906_v31  ;;  %v2232_v48 = vpop.f32.mrb[19].mxu1  ;;  %v2452_v17 = vadd.f32 %v2451_v62, %v2450_v14  ;;  %v2354_v45 = vadd.f32 %v2353_v21, %v2352_v60  ;;  %v2413_v0 = vmul.f32 %v2906_v31, %v2906_v31  ;;  %v2461_v56 = vsel %vm1425_vm8, %v2412_v61, 0.0 }
 0x1c7   : > { %2309 = vst.msk [vmem:[%s4236_s28 + $0x88] sm:$0xff] %vm1425_vm8, %v2232_v48  ;;  %v2357_v23 = vsel %vm1425_vm8, %v2232_v48, 0.0  ;;  %v2411_v28 = vmul.f32 %v2232_v48, %v2232_v48  ;;  %v2457_v35 = vsel %vm1425_vm8, %v2410_v18, 0.0  ;;  %v2361_v25 = vsel %vm1425_vm8, %v2906_v31, 0.0 }
 0x1c8   : > { %v2454_v38 = vadd.f32 %v2453_v40, %v2452_v17  ;;  %v2356_v53 = vadd.f32 %v2355_v49, %v2354_v45  ;;  %v2463_v44 = vsel %vm1425_vm8, %v2413_v0, 0.0 }
 0x1c9   : > { %v2459_v11 = vsel %vm1425_vm8, %v2411_v28, 0.0 }
 0x1ca   : > { %v2456_v59 = vadd.f32 %v2455_v55, %v2454_v38  ;;  %v2358_v12 = vadd.f32 %v2357_v23, %v2356_v53 }
 0x1cb   : > { %v2909_v29 = vpop.f32.mrb[20].mxu1 }
 0x1cc   : > { %2314 = vst.msk [vmem:[%s4236_s28 + $0xb0] sm:$0xff] %vm1425_vm8, %v2909_v29  ;;  %v2245_v43 = vpop.f32.mrb[21].mxu1  ;;  %v2360_v13 = vadd.f32 %v2359_v1, %v2358_v12  ;;  %v2367_v22 = vsel %vm1425_vm8, %v2909_v29, 0.0  ;;  %v2416_v19 = vmul.f32 %v2909_v29, %v2909_v29 }
 0x1cd   : > { %2312 = vst.msk [vmem:[%s4236_s28 + $0xa0] sm:$0xff] %vm1425_vm8, %v2245_v43  ;;  %v2910_v52 = vpop.f32.mrb[22].mxu1  ;;  %v2363_v51 = vsel %vm1425_vm8, %v2245_v43, 0.0  ;;  %v2414_v41 = vmul.f32 %v2245_v43, %v2245_v43 }
 0x1ce   : > { %v2863_v10 = vpop.f32.mrb[8].mxu0  ;;  %2315 = vst.msk [vmem:[%s4236_s28 + $0xb8] sm:$0xff] %vm1425_vm8, %v2910_v52  ;;  %v2248_v30 = vpop.f32.mrb[23].mxu1  ;;  %v2362_v3 = vadd.f32 %v2361_v25, %v2360_v13  ;;  %v2417_v49 = vmul.f32 %v2910_v52, %v2910_v52  ;;  %v2369_v45 = vsel %vm1425_vm8, %v2910_v52, 0.0  ;;  %v2469_v23 = vsel %vm1425_vm8, %v2416_v19, 0.0 }
 0x1cf   : > { %1884 = vst.msk [vmem:[%s4193_s16 + $0x50] sm:$0xff] %vm1425_vm8, %v2863_v10  ;;  %v1779_v4 = vpop.f32.mrb[9].mxu0  ;;  %v1987_v5 = vmul.f32 %v2863_v10, %v2863_v10  ;;  %v1925_v46 = vsel %vm1425_vm8, %v2863_v10, 0.0  ;;  %2313 = vst.msk [vmem:[%s4236_s28 + $0xa8] sm:$0xff] %vm1425_vm8, %v2248_v30  ;;  %v2465_v42 = vsel %vm1425_vm8, %v2414_v41, 0.0  ;;  %v2365_v14 = vsel %vm1425_vm8, %v2248_v30, 0.0 }
 0x1d0   : > { %1882 = vst.msk [vmem:[%s4193_s16 + $0x40] sm:$0xff] %vm1425_vm8, %v1779_v4  ;;  %v1921_v2 = vsel %vm1425_vm8, %v1779_v4, 0.0  ;;  %v1985_v24 = vmul.f32 %v1779_v4, %v1779_v4  ;;  %v2864_v16 = vpop.f32.mrb[10].mxu0  ;;  %v2364_v21 = vadd.f32 %v2363_v51, %v2362_v3  ;;  %v2415_v60 = vmul.f32 %v2248_v30, %v2248_v30 }
 0x1d1   : > { %v1922_v9 = vadd.f32 %v1921_v2, %v4281_v15  ;;  %1885 = vst.msk [vmem:[%s4193_s16 + $0x58] sm:$0xff] %vm1425_vm8, %v2864_v16  ;;  %v1988_v57 = vmul.f32 %v2864_v16, %v2864_v16  ;;  %v1782_v39 = vpop.f32.mrb[11].mxu0  ;;  %v2458_v15 = vadd.f32 %v2457_v35, %v2456_v59  ;;  %v2028_v36 = vsel %vm1425_vm8, %v1987_v5, 0.0 }
 0x1d2   : > { %v2024_v58 = vsel %vm1425_vm8, %v1985_v24, 0.0  ;;  %1883 = vst.msk [vmem:[%s4193_s16 + $0x48] sm:$0xff] %vm1425_vm8, %v1782_v39  ;;  %v1923_v27 = vsel %vm1425_vm8, %v1782_v39, 0.0  ;;  %v1986_v6 = vmul.f32 %v1782_v39, %v1782_v39  ;;  %v1927_v34 = vsel %vm1425_vm8, %v2864_v16, 0.0 }
 0x1d3   : > { %v2025_v26 = vadd.f32 %v2024_v58, %v4287_v63  ;;  %v1924_v54 = vadd.f32 %v1923_v27, %v1922_v9  ;;  %v2460_v8 = vadd.f32 %v2459_v11, %v2458_v15  ;;  %v2030_v32 = vsel %vm1425_vm8, %v1988_v57, 0.0  ;;  %v2913_v47 = vpop.f32.mrb[24].mxu1 }
 0x1d4   : > { %v2026_v50 = vsel %vm1425_vm8, %v1986_v6, 0.0  ;;  %2318 = vst.msk [vmem:[%s4236_s28 + $0xd0] sm:$0xff] %vm1425_vm8, %v2913_v47  ;;  %v2261_v31 = vpop.f32.mrb[25].mxu1  ;;  %v2366_v48 = vadd.f32 %v2365_v14, %v2364_v21  ;;  %v2467_v18 = vsel %vm1425_vm8, %v2415_v60, 0.0  ;;  %v2471_v10 = vsel %vm1425_vm8, %v2417_v49, 0.0 }
 0x1d5   : > { %v1926_v7 = vadd.f32 %v1925_v46, %v1924_v54  ;;  %v2027_v37 = vadd.f32 %v2026_v50, %v2025_v26  ;;  %v2462_v63 = vadd.f32 %v2461_v56, %v2460_v8  ;;  %2316 = vst.msk [vmem:[%s4236_s28 + $0xc0] sm:$0xff] %vm1425_vm8, %v2261_v31  ;;  %v2914_v17 = vpop.f32.mrb[26].mxu1  ;;  %v2418_v53 = vmul.f32 %v2261_v31, %v2261_v31 }
 0x1d6   : > { %2319 = vst.msk [vmem:[%s4236_s28 + $0xd8] sm:$0xff] %vm1425_vm8, %v2914_v17  ;;  %v2264_v55 = vpop.f32.mrb[27].mxu1  ;;  %v2368_v38 = vadd.f32 %v2367_v22, %v2366_v48  ;;  %v2371_v28 = vsel %vm1425_vm8, %v2261_v31, 0.0  ;;  %v2420_v35 = vmul.f32 %v2913_v47, %v2913_v47  ;;  %v2375_v2 = vsel %vm1425_vm8, %v2913_v47, 0.0 }
 0x1d7   : > { %v2029_v33 = vadd.f32 %v2028_v36, %v2027_v37  ;;  %v4366_v20 = vadd.f32 %v1927_v34, %v1926_v7  ;;  %v2464_v62 = vadd.f32 %v2463_v44, %v2462_v63  ;;  %2317 = vst.msk [vmem:[%s4236_s28 + $0xc8] sm:$0xff] %vm1425_vm8, %v2264_v55  ;;  %v2419_v4 = vmul.f32 %v2264_v55, %v2264_v55 }
 0x1d8   : > { %v2370_v1 = vadd.f32 %v2369_v45, %v2368_v38  ;;  %v2373_v59 = vsel %vm1425_vm8, %v2264_v55, 0.0  ;;  %v2473_v29 = vsel %vm1425_vm8, %v2418_v53, 0.0  ;;  %v2421_v25 = vmul.f32 %v2914_v17, %v2914_v17 }
 0x1d9   : > { %v4372_v40 = vadd.f32 %v2030_v32, %v2029_v33  ;;  %v2466_v61 = vadd.f32 %v2465_v42, %v2464_v62  ;;  %v2475_v9 = vsel %vm1425_vm8, %v2419_v4, 0.0  ;;  %v2377_v44 = vsel %vm1425_vm8, %v2914_v17, 0.0 }
 0x1da   : > { %v2372_v12 = vadd.f32 %v2371_v28, %v2370_v1  ;;  %v2477_v52 = vsel %vm1425_vm8, %v2420_v35, 0.0  ;;  %v2479_v30 = vsel %vm1425_vm8, %v2421_v25, 0.0 }
 0x1db   : > { %v2468_v0 = vadd.f32 %v2467_v18, %v2466_v61  ;;  %v2917_v5 = vpop.f32.mrb[28].mxu1 }
 0x1dc   : > { %2322 = vst.msk [vmem:[%s4236_s28 + $0xf0] sm:$0xff] %vm1425_vm8, %v2917_v5  ;;  %v2277_v16 = vpop.f32.mrb[29].mxu1  ;;  %v2374_v43 = vadd.f32 %v2373_v59, %v2372_v12  ;;  %v2424_v36 = vmul.f32 %v2917_v5, %v2917_v5  ;;  %v2383_v8 = vsel %vm1425_vm8, %v2917_v5, 0.0 }
 0x1dd   : > { %v2470_v56 = vadd.f32 %v2469_v23, %v2468_v0  ;;  %2320 = vst.msk [vmem:[%s4236_s28 + $0xe0] sm:$0xff] %vm1425_vm8, %v2277_v16  ;;  %v2918_v57 = vpop.f32.mrb[30].mxu1  ;;  %v2422_v27 = vmul.f32 %v2277_v16, %v2277_v16  ;;  %v2379_v15 = vsel %vm1425_vm8, %v2277_v16, 0.0 }
 0x1de   : > { %2323 = vst.msk [vmem:[%s4236_s28 + $0xf8] sm:$0xff] %vm1425_vm8, %v2918_v57  ;;  %v2280_v11 = vpop.f32.mrb[31].mxu1  ;;  %v2376_v58 = vadd.f32 %v2375_v2, %v2374_v43  ;;  %v2425_v37 = vmul.f32 %v2918_v57, %v2918_v57  ;;  %v2385_v63 = vsel %vm1425_vm8, %v2918_v57, 0.0  ;;  %v2485_v22 = vsel %vm1425_vm8, %v2424_v36, 0.0 }
 0x1df   : > { %v2472_v24 = vadd.f32 %v2471_v10, %v2470_v56  ;;  %2321 = vst.msk [vmem:[%s4236_s28 + $0xe8] sm:$0xff] %vm1425_vm8, %v2280_v11  ;;  %v2423_v26 = vmul.f32 %v2280_v11, %v2280_v11  ;;  %v2381_v13 = vsel %vm1425_vm8, %v2280_v11, 0.0  ;;  %v2481_v50 = vsel %vm1425_vm8, %v2422_v27, 0.0 }
 0x1e0   : > { %v2378_v46 = vadd.f32 %v2377_v44, %v2376_v58  ;;  %v2487_v19 = vsel %vm1425_vm8, %v2425_v37, 0.0 }
 0x1e1   : > { %v2474_v39 = vadd.f32 %v2473_v29, %v2472_v24  ;;  %v2483_v51 = vsel %vm1425_vm8, %v2423_v26, 0.0 }
 0x1e2   : > { %v2380_v34 = vadd.f32 %v2379_v15, %v2378_v46 }
 0x1e3   : > { %v2476_v6 = vadd.f32 %v2475_v9, %v2474_v39 }
 0x1e4   : > { %v2382_v3 = vadd.f32 %v2381_v13, %v2380_v34 }
 0x1e5   : > { %v2478_v54 = vadd.f32 %v2477_v52, %v2476_v6 }
 0x1e6   : > { %v2384_v41 = vadd.f32 %v2383_v8, %v2382_v3 }
 0x1e7   : > { %v2480_v7 = vadd.f32 %v2479_v30, %v2478_v54 }
 0x1e8   : > { %v2386_v21 = vadd.f32 %v2385_v63, %v2384_v41 }
 0x1e9   : > { %v2482_v32 = vadd.f32 %v2481_v50, %v2480_v7 }
 0x1ea   : > { %v2387_v14 = vrot.slane %v2386_v21, 4 }
 0x1eb   : > { %v2484_v33 = vadd.f32 %v2483_v51, %v2482_v32 }
 0x1ec   : > { %v2388_v38 = vadd.f32 %v2387_v14, %v2386_v21 }
 0x1ed   : > { %v2486_v62 = vadd.f32 %v2485_v22, %v2484_v33 }
 0x1ee   : > { %v2867_v47 = vpop.f32.mrb[12].mxu0  ;;  %v2389_v4 = vrot.slane %v2388_v38, 2 }
 0x1ef   : > { %1888 = vst.msk [vmem:[%s4193_s16 + $0x70] sm:$0xff] %vm1425_vm8, %v2867_v47  ;;  %v1795_v42 = vpop.f32.mrb[13].mxu0  ;;  %v2488_v48 = vadd.f32 %v2487_v19, %v2486_v62  ;;  %v1991_v17 = vmul.f32 %v2867_v47, %v2867_v47 }
 0x1f0   : > { %1886 = vst.msk [vmem:[%s4193_s16 + $0x60] sm:$0xff] %vm1425_vm8, %v1795_v42  ;;  %v1929_v60 = vsel %vm1425_vm8, %v1795_v42, 0.0  ;;  %v1989_v31 = vmul.f32 %v1795_v42, %v1795_v42  ;;  %v2868_v49 = vpop.f32.mrb[14].mxu0 }
 0x1f1   : > { %v1930_v61 = vadd.f32 %v1929_v60, %v4366_v20  ;;  %1889 = vst.msk [vmem:[%s4193_s16 + $0x78] sm:$0xff] %vm1425_vm8, %v2868_v49  ;;  %v1798_v45 = vpop.f32.mrb[15].mxu0  ;;  %v2489_v28 = vrot.slane %v2488_v48, 4  ;;  %v1933_v20 = vsel %vm1425_vm8, %v2867_v47, 0.0  ;;  %v1992_v10 = vmul.f32 %v2868_v49, %v2868_v49 }
 0x1f2   : > { %v2032_v18 = vsel %vm1425_vm8, %v1989_v31, 0.0  ;;  %1887 = vst.msk [vmem:[%s4193_s16 + $0x68] sm:$0xff] %vm1425_vm8, %v1798_v45  ;;  %v1931_v55 = vsel %vm1425_vm8, %v1798_v45, 0.0  ;;  %v1990_v23 = vmul.f32 %v1798_v45, %v1798_v45  ;;  %v2036_v12 = vsel %vm1425_vm8, %v1991_v17, 0.0 }
 0x1f3   : > { %v2033_v53 = vadd.f32 %v2032_v18, %v4372_v40  ;;  %v1932_v0 = vadd.f32 %v1931_v55, %v1930_v61  ;;  %v2490_v35 = vadd.f32 %v2489_v28, %v2488_v48  ;;  %v1935_v29 = vsel %vm1425_vm8, %v2868_v49, 0.0 }
 0x1f4   : > { %v2034_v1 = vsel %vm1425_vm8, %v1990_v23, 0.0  ;;  %v2390_v40 = vadd.f32 %v2389_v4, %v2388_v38  ;;  %v2038_v16 = vsel %vm1425_vm8, %v1992_v10, 0.0 }
 0x1f5   : > { %v1934_v56 = vadd.f32 %v1933_v20, %v1932_v0  ;;  %v2035_v59 = vadd.f32 %v2034_v1, %v2033_v53  ;;  %v2491_v24 = vrot.slane %v2490_v35, 2 }
 0x1f6   : > { %v2391_v25 = vrot.slane %v2390_v40, 1 }
 0x1f7   : > { %v2037_v5 = vadd.f32 %v2036_v12, %v2035_v59  ;;  %v1936_v2 = vadd.f32 %v1935_v29, %v1934_v56  ;;  %v2492_v9 = vadd.f32 %v2491_v24, %v2490_v35 }
 0x1f8   : > { %v2392_v57 = vadd.f32 %v2391_v25, %v2390_v40 }
 0x1f9   : > { %v2039_v43 = vadd.f32 %v2038_v16, %v2037_v5  ;;  %v2493_v39 = vrot.slane %v2492_v9, 1 }
 0x1fa   : > { %2393 = vst.msk [vmem:[%s269_s10] sm:$0x1] %vm1975_vm0, %v2392_v57 }
 0x1fb   : > { %v2494_v44 = vadd.f32 %v2493_v39, %v2492_v9 }
 0x1fd   : > { %2495 = vst.msk [vmem:[%s269_s10 + $0x1] sm:$0x1] %vm1975_vm0, %v2494_v44 }
 0x1fe   : > { %3008 = shalt.err (!%p3005_p3)
}
 0x1ff   : > { %s3009_s28 = scalar_lea.hbm %s4440_s18, 32  ;;  %s3013_s17 = scalar_lea.hbm %s4582_s6, 64 }
 0x200   : > { %p3010_p4 = scmp.ne.s32.totalorder %s4440_s18, %s3009_s28  ;;  %p3014_p9 = scmp.lt.u32.totalorder %s4440_s18, %s4582_s6 }
 0x201   : > { %p3015_p10 = scmp.lt.u32.totalorder %s3013_s17, %s3009_s28  ;;  %p3017_p12 = scmp.lt.u32.totalorder %s3009_s28, %s4440_s18 }
 0x202   : > { %p3011_p7 = pnand %p3010_p4, %p3174_p5 }
 0x203   : > { %p3016_p11 = por %p3015_p10, %p3014_p9 }
 0x204   : > { %p3012_p8 = pneg %p3011_p7 }
 0x205   : > { %p3018_p13 = por %p3017_p12, %p3016_p11 }
 0x207   : > { %p3019_p0 = pnand %p3018_p13, %p3012_p8 }
 0x209   : > { %3022 = shalt.err (!%p3019_p0)
}
 0x20a   : > { %2923 = dma.vmem_to_hbm [thread:$0]  (%p3174_p5), %s2545_s20, 32, %s4440_s18, %s2512_s13  }
 0x20b   : > { %s4532_s14 = scalar_lea.hbm %s4580_s4, %s2805_s11  ;;  %s3100_s28 = smov [#allocation2]  }
 0x20c   : > { %s3027_s25 = sshll.u32 %s3100_s28, 4  ;;  %s3028_s25 = int_to_ptr.vmem [resolvable:$false] %s3027_s25 }
 0x20d   : > { %s3029_s10 = scalar_lea.vmem %s3028_s25, 64 }
 0x20e   : > { %v2871_v11 = vpop.f32.mrb[16].mxu0 }
 0x20f   : > { %1892 = vst.msk [vmem:[%s4193_s16 + $0x90] sm:$0xff] %vm1425_vm8, %v2871_v11  ;;  %v1811_v52 = vpop.f32.mrb[17].mxu0  ;;  %v1995_v46 = vmul.f32 %v2871_v11, %v2871_v11  ;;  %v1941_v50 = vsel %vm1425_vm8, %v2871_v11, 0.0 }
 0x210   : > { %1890 = vst.msk [vmem:[%s4193_s16 + $0x80] sm:$0xff] %vm1425_vm8, %v1811_v52  ;;  %v1937_v58 = vsel %vm1425_vm8, %v1811_v52, 0.0  ;;  %v1993_v27 = vmul.f32 %v1811_v52, %v1811_v52  ;;  %v2872_v6 = vpop.f32.mrb[18].mxu0 }
 0x211   : > { %v1938_v15 = vadd.f32 %v1937_v58, %v1936_v2  ;;  %1893 = vst.msk [vmem:[%s4193_s16 + $0x98] sm:$0xff] %vm1425_vm8, %v2872_v6  ;;  %v1814_v30 = vpop.f32.mrb[19].mxu0  ;;  %v1996_v8 = vmul.f32 %v2872_v6, %v2872_v6  ;;  %v2044_v51 = vsel %vm1425_vm8, %v1995_v46, 0.0  ;;  %v1943_v32 = vsel %vm1425_vm8, %v2872_v6, 0.0 }
 0x212   : > { %v2040_v26 = vsel %vm1425_vm8, %v1993_v27, 0.0  ;;  %1891 = vst.msk [vmem:[%s4193_s16 + $0x88] sm:$0xff] %vm1425_vm8, %v1814_v30  ;;  %v1939_v54 = vsel %vm1425_vm8, %v1814_v30, 0.0  ;;  %v1994_v13 = vmul.f32 %v1814_v30, %v1814_v30 }
 0x213   : > { %v2041_v36 = vadd.f32 %v2040_v26, %v2039_v43  ;;  %v1940_v34 = vadd.f32 %v1939_v54, %v1938_v15  ;;  %v2046_v41 = vsel %vm1425_vm8, %v1996_v8, 0.0 }
 0x214   : > { %v2042_v7 = vsel %vm1425_vm8, %v1994_v13, 0.0 }
 0x215   : > { %v1942_v37 = vadd.f32 %v1941_v50, %v1940_v34  ;;  %v2043_v3 = vadd.f32 %v2042_v7, %v2041_v36 }
 0x217   : > { %v2045_v63 = vadd.f32 %v2044_v51, %v2043_v3  ;;  %v1944_v22 = vadd.f32 %v1943_v32, %v1942_v37 }
 0x219   : > { %v2047_v33 = vadd.f32 %v2046_v41, %v2045_v63 }
 0x22e   : > { %v2875_v19 = vpop.f32.mrb[20].mxu0 }
 0x22f   : > { %1896 = vst.msk [vmem:[%s4193_s16 + $0xb0] sm:$0xff] %vm1425_vm8, %v2875_v19  ;;  %v1827_v21 = vpop.f32.mrb[21].mxu0  ;;  %v1999_v31 = vmul.f32 %v2875_v19, %v2875_v19  ;;  %v1949_v18 = vsel %vm1425_vm8, %v2875_v19, 0.0 }
 0x230   : > { %1894 = vst.msk [vmem:[%s4193_s16 + $0xa0] sm:$0xff] %vm1425_vm8, %v1827_v21  ;;  %v1945_v47 = vsel %vm1425_vm8, %v1827_v21, 0.0  ;;  %v1997_v62 = vmul.f32 %v1827_v21, %v1827_v21  ;;  %v2876_v42 = vpop.f32.mrb[22].mxu0 }
 0x231   : > { %v1946_v14 = vadd.f32 %v1945_v47, %v1944_v22  ;;  %1897 = vst.msk [vmem:[%s4193_s16 + $0xb8] sm:$0xff] %vm1425_vm8, %v2876_v42  ;;  %v1830_v60 = vpop.f32.mrb[23].mxu0  ;;  %v2000_v55 = vmul.f32 %v2876_v42, %v2876_v42  ;;  %v2052_v0 = vsel %vm1425_vm8, %v1999_v31, 0.0  ;;  %v1951_v28 = vsel %vm1425_vm8, %v2876_v42, 0.0 }
 0x232   : > { %v2048_v49 = vsel %vm1425_vm8, %v1997_v62, 0.0  ;;  %1895 = vst.msk [vmem:[%s4193_s16 + $0xa8] sm:$0xff] %vm1425_vm8, %v1830_v60  ;;  %v1947_v48 = vsel %vm1425_vm8, %v1830_v60, 0.0  ;;  %v1998_v17 = vmul.f32 %v1830_v60, %v1830_v60 }
 0x233   : > { %v2049_v61 = vadd.f32 %v2048_v49, %v2047_v33  ;;  %v1948_v45 = vadd.f32 %v1947_v48, %v1946_v14  ;;  %v2054_v1 = vsel %vm1425_vm8, %v2000_v55, 0.0 }
 0x234   : > { %v2050_v23 = vsel %vm1425_vm8, %v1998_v17, 0.0 }
 0x235   : > { %v1950_v38 = vadd.f32 %v1949_v18, %v1948_v45  ;;  %v2051_v53 = vadd.f32 %v2050_v23, %v2049_v61 }
 0x237   : > { %v2053_v20 = vadd.f32 %v2052_v0, %v2051_v53  ;;  %v1952_v10 = vadd.f32 %v1951_v28, %v1950_v38 }
 0x239   : > { %v2055_v4 = vadd.f32 %v2054_v1, %v2053_v20 }
 0x24e   : > { %v2879_v56 = vpop.f32.mrb[24].mxu0 }
 0x24f   : > { %1900 = vst.msk [vmem:[%s4193_s16 + $0xd0] sm:$0xff] %vm1425_vm8, %v2879_v56  ;;  %v1843_v59 = vpop.f32.mrb[25].mxu0  ;;  %v2003_v2 = vmul.f32 %v2879_v56, %v2879_v56  ;;  %v1957_v57 = vsel %vm1425_vm8, %v2879_v56, 0.0 }
 0x250   : > { %1898 = vst.msk [vmem:[%s4193_s16 + $0xc0] sm:$0xff] %vm1425_vm8, %v1843_v59  ;;  %v1953_v35 = vsel %vm1425_vm8, %v1843_v59, 0.0  ;;  %v2001_v12 = vmul.f32 %v1843_v59, %v1843_v59  ;;  %v2880_v29 = vpop.f32.mrb[26].mxu0 }
 0x251   : > { %v1954_v40 = vadd.f32 %v1953_v35, %v1952_v10  ;;  %1901 = vst.msk [vmem:[%s4193_s16 + $0xd8] sm:$0xff] %vm1425_vm8, %v2880_v29  ;;  %v1846_v5 = vpop.f32.mrb[27].mxu0  ;;  %v2004_v39 = vmul.f32 %v2880_v29, %v2880_v29  ;;  %v2060_v58 = vsel %vm1425_vm8, %v2003_v2, 0.0  ;;  %v1959_v27 = vsel %vm1425_vm8, %v2880_v29, 0.0 }
 0x252   : > { %v2056_v24 = vsel %vm1425_vm8, %v2001_v12, 0.0  ;;  %1899 = vst.msk [vmem:[%s4193_s16 + $0xc8] sm:$0xff] %vm1425_vm8, %v1846_v5  ;;  %v1955_v16 = vsel %vm1425_vm8, %v1846_v5, 0.0  ;;  %v2002_v25 = vmul.f32 %v1846_v5, %v1846_v5 }
 0x253   : > { %v2057_v43 = vadd.f32 %v2056_v24, %v2055_v4  ;;  %v1956_v9 = vadd.f32 %v1955_v16, %v1954_v40  ;;  %v2062_v30 = vsel %vm1425_vm8, %v2004_v39, 0.0 }
 0x254   : > { %v2058_v44 = vsel %vm1425_vm8, %v2002_v25, 0.0 }
 0x255   : > { %v1958_v11 = vadd.f32 %v1957_v57, %v1956_v9  ;;  %v2059_v52 = vadd.f32 %v2058_v44, %v2057_v43 }
 0x257   : > { %v2061_v6 = vadd.f32 %v2060_v58, %v2059_v52  ;;  %v1960_v15 = vadd.f32 %v1959_v27, %v1958_v11 }
 0x259   : > { %v2063_v46 = vadd.f32 %v2062_v30, %v2061_v6 }
 0x26b   : > { %v2883_v26 = vpop.f32.mrb[28].mxu0 }
 0x26c   : > { %1904 = vst.msk [vmem:[%s4193_s16 + $0xf0] sm:$0xff] %vm1425_vm8, %v2883_v26  ;;  %v1859_v54 = vpop.f32.mrb[29].mxu0  ;;  %v2007_v7 = vmul.f32 %v2883_v26, %v2883_v26  ;;  %v1965_v22 = vsel %vm1425_vm8, %v2883_v26, 0.0 }
 0x26d   : > { %1902 = vst.msk [vmem:[%s4193_s16 + $0xe0] sm:$0xff] %vm1425_vm8, %v1859_v54  ;;  %v1961_v13 = vsel %vm1425_vm8, %v1859_v54, 0.0  ;;  %v2005_v36 = vmul.f32 %v1859_v54, %v1859_v54  ;;  %v2884_v34 = vpop.f32.mrb[30].mxu0 }
 0x26e   : > { %v1962_v50 = vadd.f32 %v1961_v13, %v1960_v15  ;;  %1905 = vst.msk [vmem:[%s4193_s16 + $0xf8] sm:$0xff] %vm1425_vm8, %v2884_v34  ;;  %v1862_v8 = vpop.f32.mrb[31].mxu0  ;;  %v2008_v41 = vmul.f32 %v2884_v34, %v2884_v34  ;;  %v2068_v47 = vsel %vm1425_vm8, %v2007_v7, 0.0  ;;  %v1967_v62 = vsel %vm1425_vm8, %v2884_v34, 0.0 }
 0x26f   : > { %v2064_v37 = vsel %vm1425_vm8, %v2005_v36, 0.0  ;;  %1903 = vst.msk [vmem:[%s4193_s16 + $0xe8] sm:$0xff] %vm1425_vm8, %v1862_v8  ;;  %v1963_v3 = vsel %vm1425_vm8, %v1862_v8, 0.0  ;;  %v2006_v51 = vmul.f32 %v1862_v8, %v1862_v8  ;;  %s255_s16 = scalar_lea.vmem [#allocation2], %s2689_s29  ;;  %s2502_s29 = scalar_lea.sflag [#allocation3], %s4422_s9 }
 0x270   : > { %v2065_v32 = vadd.f32 %v2064_v37, %v2063_v46  ;;  %v1964_v63 = vadd.f32 %v1963_v3, %v1962_v50  ;;  %v2070_v60 = vsel %vm1425_vm8, %v2008_v41, 0.0  ;;  %s2528_s18 = sshll.u32 %s255_s16, 4  ;;  %s4534_s18 = int_to_ptr.vmem [resolvable:$true] %s2528_s18 }
 0x271   : > { %v2066_v33 = vsel %vm1425_vm8, %v2006_v51, 0.0  ;;  %s3023_s26 = scalar_lea.vmem %s4534_s18, 32  ;;  %p3030_p4 = scmp.lt.s32.totalorder %s4534_s18, %s3028_s25 }
 0x272   : > { %v1966_v19 = vadd.f32 %v1965_v22, %v1964_v63  ;;  %v2067_v21 = vadd.f32 %v2066_v33, %v2065_v32  ;;  %p3024_p1 = scmp.ne.s32.totalorder %s4534_s18, %s3023_s26  ;;  %p3031_p7 = scmp.lt.s32.totalorder %s3029_s10, %s3023_s26 }
 0x274   : > { %v1968_v42 = vadd.f32 %v1967_v62, %v1966_v19  ;;  %v2069_v14 = vadd.f32 %v2068_v47, %v2067_v21  ;;  %p3025_p2 = pnand %p3024_p1, %p3174_p5  ;;  %p3032_p8 = por %p3031_p7, %p3030_p4 }
 0x276   : > { %v1969_v31 = vrot.slane %v1968_v42, 4  ;;  %v2071_v49 = vadd.f32 %v2070_v60, %v2069_v14  ;;  %p3026_p3 = pneg %p3025_p2 }
 0x278   : > { %v1970_v48 = vadd.f32 %v1969_v31, %v1968_v42  ;;  %v2072_v17 = vrot.slane %v2071_v49, 4  ;;  %p3033_p9 = pnand %p3032_p8, %p3026_p3 }
 0x27a   : > { %v1971_v61 = vrot.slane %v1970_v48, 2  ;;  %v2073_v45 = vadd.f32 %v2072_v17, %v2071_v49 }
 0x27c   : > { %v1972_v18 = vadd.f32 %v1971_v61, %v1970_v48  ;;  %v2074_v55 = vrot.slane %v2073_v45, 2 }
 0x27e   : > { %v1973_v23 = vrot.slane %v1972_v18, 1  ;;  %v2075_v38 = vadd.f32 %v2074_v55, %v2073_v45 }
 0x280   : > { %v1974_v53 = vadd.f32 %v1973_v23, %v1972_v18  ;;  %v2076_v0 = vrot.slane %v2075_v38, 1 }
 0x282   : > { %1976 = vst.msk [vmem:[%s255_s16] sm:$0x1] %vm1975_vm0, %v1974_v53  ;;  %v2077_v28 = vadd.f32 %v2076_v0, %v2075_v38 }
 0x284   : > { %2078 = vst.msk [vmem:[%s255_s16 + $0x1] sm:$0x1] %vm1975_vm0, %v2077_v28 }
 0x285   : > { %3036 = shalt.err (!%p3033_p9)
}
 0x286   : > { %s3037_s9 = scalar_lea.hbm %s4532_s14, 32  ;;  %s3041_s17 = scalar_lea.hbm %s4580_s4, 64 }
 0x287   : > { %p3038_p10 = scmp.ne.s32.totalorder %s4532_s14, %s3037_s9  ;;  %p3042_p13 = scmp.lt.u32.totalorder %s4532_s14, %s4580_s4 }
 0x288   : > { %p3043_p0 = scmp.lt.u32.totalorder %s3041_s17, %s3037_s9  ;;  %p3045_p2 = scmp.lt.u32.totalorder %s3037_s9, %s4532_s14 }
 0x289   : > { %p3039_p11 = pnand %p3038_p10, %p3174_p5 }
 0x28a   : > { %p3044_p1 = por %p3043_p0, %p3042_p13 }
 0x28b   : > { %p3040_p12 = pneg %p3039_p11 }
 0x28c   : > { %p3046_p3 = por %p3045_p2, %p3044_p1 }
 0x28e   : > { %p3047_p4 = pnand %p3046_p3, %p3040_p12 }
 0x290   : > { %3050 = shalt.err (!%p3047_p4)
}
 0x291   : > { %2922 = dma.vmem_to_hbm [thread:$0]  (%p3174_p5), %s4534_s18, 32, %s4532_s14, %s2502_s29  }
 0x292 PF: > { %p2933_p7 = scmp.ge.s32.totalorder %s3089_s24, 2  ;;  %s2564_s16 = sand.u32 1, %s3077_s21  }
 0x293   : > { %s2565_s20 = scalar_lea.sflag [#allocation3], %s2564_s16 }
 0x294   : > { %p2927_p8 = pnand %p2933_p7, %p3178_p6 }
 0x296   : > { %3068 = dma.done.wait (!%p2927_p8), %s2565_s20, 32  }
 0x297   : > { %3070 = vsyncadd (!%p2927_p8), %s2565_s20, 4294967264  ;;  %s2582_s13 = scalar_lea.sflag [#allocation5], %s2564_s16 }
 0x298   : > { %3072 = dma.done.wait (!%p2927_p8), %s2582_s13, 32  }
 0x299   : > { %3074 = vsyncadd (!%p2927_p8), %s2582_s13, 4294967264  ;;  %p20_p5 = scmp.ge.s32.totalorder %s3161_s27, 4   ;;  %s4589_s21 = smov %s3081_s22 }
 0x29a   : > { %s4590_s22 = smov %s3085_s23  ;;  %s4591_s23 = smov %s3172_s30 }
 0x29b   : > { %s4592_s24 = smov %s3161_s27  ;;  %22 = sbr.rel (!%p20_p5) target bundleno = 5 (0x5), region = 108 }
 0x2a2   :  { %2587 = vsyncpa [#allocation3], 1 }
 0x2a3   :  { %2589 = vsyncpa [#allocation3 + $0x1], 1 }
 0x2a4   :  { %2590 = vsyncpa [#allocation5], 1 }
 0x2a5   :  { %2592 = vsyncpa [#allocation5 + $0x1], 1 }

</bundles_post_ra>
